<compile_context>
chip_gen: v7x
topology: tpu7x:2x2x1
jax: 0.10.0
libtpu: 0.0.40
codegen_flags: <defaults>
</compile_context>

<pallas_src>
import jax
import jax.numpy as jnp
from jax import lax
from jax.experimental import pallas as pl
from jax.experimental.pallas import tpu as pltpu

EPS = 1e-5


def _round_up(n, m):
    return ((n + m - 1) // m) * m


def _make_kernel(B, C, H, W, Crp, dil):
    L = H * W
    # flat lane shift within one image for each of the 9 dilated taps
    taps = [(kh - 1) * dil * W + (kw - 1) * dil
            for kh in range(3) for kw in range(3)]

    def kernel(x_ref, mask_ref, w1_ref, w2a_ref, w2b_ref, w3_ref, p_ref,
               out_ref, z_scr, s2a_sum, s2a_ssq):
        bi = pl.program_id(0)
        p = p_ref[...]                                  # (Crp, 10) packed params
        b1, b2a = p[:, 0:1], p[:, 1:2]
        maskb = mask_ref[...]                           # (9*Crp, L), 0/1 f32

        def patches_of(inp):                            # (Crp, L) -> (9*Crp, L)
            pieces = [inp if s == 0 else pltpu.roll(inp, shift=(-s) % L, axis=1)
                      for s in taps]
            return jnp.concatenate(pieces, axis=0) * maskb

        # ---- per-image work (overlapped with the next x HBM DMA) -----------
        @pl.when(bi == 0)
        def _():
            s2a_sum[...] = jnp.zeros_like(s2a_sum)
            s2a_ssq[...] = jnp.zeros_like(s2a_ssq)

        # conv1: 1x1 conv == channel-mixing MXU matmul
        y1 = jnp.dot(w1_ref[...], x_ref[0],
                     preferred_element_type=jnp.float32) + b1          # (Crp, L)
        # conv2a: fused 9-tap dilated conv, one K=9*Crp matmul per image
        z2a = jnp.dot(w2a_ref[...], patches_of(y1),
                      preferred_element_type=jnp.float32) + b2a        # (Crp, L)
        z_scr[bi] = z2a
        s2a_sum[...] += jnp.sum(z2a, axis=1, keepdims=True)
        s2a_ssq[...] += jnp.sum(z2a * z2a, axis=1, keepdims=True)

        # ---- epilogue on the last grid step ---------------------------------
        @pl.when(bi == B - 1)
        def _():
            g2a, be2a = p[:, 2:3], p[:, 3:4]
            b2b, g2b, be2b = p[:, 4:5], p[:, 5:6], p[:, 6:7]
            b3, g3, be3 = p[0:1, 7:8], p[0:1, 8:9], p[0:1, 9:10]
            cnt = jnp.float32(B * L)

            def bn_affine(s, ss, g, be):
                mean = s / cnt
                var = ss / cnt - mean * mean
                scale = g * lax.rsqrt(var + EPS)
                return scale, be - mean * scale

            # BN2a finalize, then conv2b per image (fori_loop -> O(1) live)
            sc2a, sh2a = bn_affine(s2a_sum[...], s2a_ssq[...], g2a, be2a)
            w2b = w2b_ref[...]

            def conv2b_body(b, carry):
                s, ss = carry
                a = jnp.maximum(z_scr[b] * sc2a + sh2a, 0.0)
                z = jnp.dot(w2b, patches_of(a),
                            preferred_element_type=jnp.float32) + b2b
                z_scr[b] = z                            # overwrite in place
                return (s + jnp.sum(z, axis=1, keepdims=True),
                        ss + jnp.sum(z * z, axis=1, keepdims=True))

            zc = jnp.zeros((Crp, 1), jnp.float32)
            s2b, ss2b = lax.fori_loop(0, B, conv2b_body, (zc, zc))

            # BN2b finalize, conv3 on VPU (multiply + sublane reduce) per image
            sc2b, sh2b = bn_affine(s2b, ss2b, g2b, be2b)
            w3col = w3_ref[...]                         # (Crp, 1)

            def conv3_body(b, carry):
                s, ss = carry
                a = jnp.maximum(z_scr[b] * sc2b + sh2b, 0.0)
                y3 = jnp.sum(a * w3col, axis=0, keepdims=True) + b3    # (1, L)
                out_ref[pl.ds(b, 1), :] = y3            # lane-dense row store
                return (s + jnp.sum(y3, keepdims=True),
                        ss + jnp.sum(y3 * y3, keepdims=True))

            z1 = jnp.zeros((1, 1), jnp.float32)
            s3, ss3 = lax.fori_loop(0, B, conv3_body, (z1, z1))

            # final BatchNorm over the resident (B, L) gate
            sc3, sh3 = bn_affine(s3, ss3, g3, be3)
            out_ref[...] = out_ref[...] * sc3 + sh3

    return kernel


def _build_masks(H, W, dil, Crp):
    """Boundary-validity masks for the 9 dilated taps, pre-broadcast to
    (9*Crp, H*W) f32 so the kernel applies them with one multiply."""
    L = H * W
    pos = jnp.arange(L)
    hh, ww = pos // W, pos % W
    rows = []
    for kh in range(3):
        for kw in range(3):
            dh, dw = (kh - 1) * dil, (kw - 1) * dil
            valid = ((hh + dh >= 0) & (hh + dh < H) &
                     (ww + dw >= 0) & (ww + dw < W)).astype(jnp.float32)
            rows.append(jnp.broadcast_to(valid[None, :], (Crp, L)))
    return jnp.concatenate(rows, axis=0)


def pack_params(raw, C, reduction=16):
    """Repack torch-layout parameters into the kernel's padded layouts."""
    Cr = C // reduction
    Crp = max(8, _round_up(Cr, 8))

    w1 = jnp.zeros((Crp, C), jnp.float32).at[:Cr].set(
        raw['conv1_w'].reshape(Cr, C))

    def fuse33(w):
        # (Cr, Cr, 3, 3) -> (Crp, 9*Crp); column index = tap*Crp + in_channel,
        # matching the tap-major patch concatenation inside the kernel.
        wp = jnp.zeros((Crp, Crp, 3, 3), jnp.float32).at[:Cr, :Cr].set(w)
        return jnp.transpose(wp, (0, 2, 3, 1)).reshape(Crp, 9 * Crp)

    # conv3 weight as a column so the kernel can do VPU multiply + sublane sum
    w3 = jnp.zeros((Crp, 1), jnp.float32).at[:Cr, 0].set(
        raw['conv3_w'].reshape(Cr))

    pvec = jnp.zeros((Crp, 10), jnp.float32)
    pvec = pvec.at[:Cr, 0].set(raw['conv1_b'])
    pvec = pvec.at[:Cr, 1].set(raw['conv2a_b'])
    pvec = pvec.at[:Cr, 2].set(raw['g2a'])
    pvec = pvec.at[:Cr, 3].set(raw['be2a'])
    pvec = pvec.at[:Cr, 4].set(raw['conv2b_b'])
    pvec = pvec.at[:Cr, 5].set(raw['g2b'])
    pvec = pvec.at[:Cr, 6].set(raw['be2b'])
    pvec = pvec.at[0, 7].set(raw['conv3_b'][0])
    pvec = pvec.at[0, 8].set(raw['g3'][0])
    pvec = pvec.at[0, 9].set(raw['be3'][0])

    return {'w1': w1, 'w2a': fuse33(raw['conv2a_w']),
            'w2b': fuse33(raw['conv2b_w']), 'w3': w3, 'pvec': pvec}


def spatial_gate(x_nchw, params, *, dilation_val=4):
    B, C, H, W = x_nchw.shape
    L = H * W
    Crp = params['w1'].shape[0]

    x3d = x_nchw.reshape(B, C, L).astype(jnp.float32)   # free view of NCHW
    maskb = _build_masks(H, W, dilation_val, Crp)

    kernel = _make_kernel(B, C, H, W, Crp, dilation_val)

    # explicit VMEM budget (v5e scoped default is only 16 MiB)
    est_bytes = (2 * C * L                # double-buffered x blocks
                 + B * Crp * L            # per-image activation scratch
                 + 9 * Crp * L            # masks
                 + 2 * Crp * 9 * Crp      # fused conv2 weights
                 + Crp * C + Crp * 11     # w1 + w3 + packed params
                 + B * L) * 4             # resident output
    vmem_limit = int(min(max(4 * est_bytes, 16 * 1024 * 1024),
                         64 * 1024 * 1024))

    gate = pl.pallas_call(
        kernel,
        out_shape=jax.ShapeDtypeStruct((B, L), jnp.float32),
        grid=(B,),
        in_specs=[
            pl.BlockSpec((1, C, L), lambda b: (b, 0, 0)),       # streamed per image
            pl.BlockSpec((9 * Crp, L), lambda b: (0, 0)),       # tap masks (resident)
            pl.BlockSpec((Crp, C), lambda b: (0, 0)),           # w1
            pl.BlockSpec((Crp, 9 * Crp), lambda b: (0, 0)),     # fused conv2a
            pl.BlockSpec((Crp, 9 * Crp), lambda b: (0, 0)),     # fused conv2b
            pl.BlockSpec((Crp, 1), lambda b: (0, 0)),           # w3 column
            pl.BlockSpec((Crp, 10), lambda b: (0, 0)),          # packed small params
        ],
        out_specs=pl.BlockSpec((B, L), lambda b: (0, 0)),
        scratch_shapes=[pltpu.VMEM((B, Crp, L), jnp.float32),   # z2a / z2b
                        pltpu.VMEM((Crp, 1), jnp.float32),      # BN2a sum
                        pltpu.VMEM((Crp, 1), jnp.float32)],     # BN2a sumsq
        compiler_params=pltpu.CompilerParams(
            # batch axis carries BN reductions + resident output -> arbitrary
            dimension_semantics=("arbitrary",),
            vmem_limit_bytes=vmem_limit),
    )(x3d, maskb, params['w1'], params['w2a'], params['w2b'], params['w3'],
      params['pvec'])

    # expand_as(x): broadcast the single-channel gate over all C channels.
    # Left to XLA so a downstream consumer (e.g. x * gate) can fuse it away.
    return jnp.broadcast_to(gate.reshape(B, 1, H, W), (B, C, H, W))


# ----------------------- pure-JAX reference (NCHW) --------------------------
def reference(x, raw, *, dil=4):
    def conv(inp, w, b, pad, d):
        y = lax.conv_general_dilated(
            inp, w, window_strides=(1, 1),
            padding=((pad, pad), (pad, pad)),
            rhs_dilation=(d, d),
            dimension_numbers=('NCHW', 'OIHW', 'NCHW'))
        return y + b.reshape(1, -1, 1, 1)

    def bn(y, g, b):
        mean = jnp.mean(y, axis=(0, 2, 3), keepdims=True)
        var = jnp.mean((y - mean) ** 2, axis=(0, 2, 3), keepdims=True)
        return ((y - mean) * lax.rsqrt(var + EPS) * g.reshape(1, -1, 1, 1)
                + b.reshape(1, -1, 1, 1))

    y = conv(x, raw['conv1_w'], raw['conv1_b'], 0, 1)
    y = jax.nn.relu(bn(conv(y, raw['conv2a_w'], raw['conv2a_b'], dil, dil),
                       raw['g2a'], raw['be2a']))
    y = jax.nn.relu(bn(conv(y, raw['conv2b_w'], raw['conv2b_b'], dil, dil),
                       raw['g2b'], raw['be2b']))
    y = bn(conv(y, raw['conv3_w'], raw['conv3_b'], 0, 1), raw['g3'], raw['be3'])
    return jnp.broadcast_to(y, x.shape)


if __name__ == "__main__":
    B, C, H, W = 2, 64, 16, 16          # channel must be >= reduction (=16)
    reduction, dil = 16, 4
    Cr = C // reduction

    key = jax.random.PRNGKey(0)
    ks = jax.random.split(key, 16)
    raw = {
        'conv1_w':  0.1 * jax.random.normal(ks[0],  (Cr, C, 1, 1), jnp.float32),
        'conv1_b':  0.1 * jax.random.normal(ks[1],  (Cr,),         jnp.float32),
        'conv2a_w': 0.1 * jax.random.normal(ks[2],  (Cr, Cr, 3, 3), jnp.float32),
        'conv2a_b': 0.1 * jax.random.normal(ks[3],  (Cr,),         jnp.float32),
        'g2a':  1.0 + 0.1 * jax.random.normal(ks[4], (Cr,), jnp.float32),
        'be2a':       0.1 * jax.random.normal(ks[5], (Cr,), jnp.float32),
        'conv2b_w': 0.1 * jax.random.normal(ks[6],  (Cr, Cr, 3, 3), jnp.float32),
        'conv2b_b': 0.1 * jax.random.normal(ks[7],  (Cr,),         jnp.float32),
        'g2b':  1.0 + 0.1 * jax.random.normal(ks[8], (Cr,), jnp.float32),
        'be2b':       0.1 * jax.random.normal(ks[9], (Cr,), jnp.float32),
        'conv3_w': 0.1 * jax.random.normal(ks[10], (1, Cr, 1, 1), jnp.float32),
        'conv3_b': 0.1 * jax.random.normal(ks[11], (1,),          jnp.float32),
        'g3':  1.0 + 0.1 * jax.random.normal(ks[12], (1,), jnp.float32),
        'be3':       0.1 * jax.random.normal(ks[13], (1,), jnp.float32),
    }
    x = jax.random.normal(ks[15], (B, C, H, W), jnp.float32)

    params = pack_params(raw, C, reduction=reduction)

    out = jax.block_until_ready(spatial_gate(x, params, dilation_val=dil))
    ref = jax.block_until_ready(reference(x, raw, dil=dil))

    assert out.shape == x.shape, (out.shape, x.shape)
    err = float(jnp.max(jnp.abs(out - ref)))
    assert err < 1e-3, f"max abs error vs reference: {err}"
    print("KERNEL_OK")
</pallas_src>

<mosaic_0001>
module attributes {stable_mosaic.version = 11 : i64} {
  func.func @kernel(%arg0: i32, %arg1: memref<1x64x256xf32, #tpu.memory_space<vmem>>, %arg2: memref<72x256xf32, #tpu.memory_space<vmem>>, %arg3: memref<8x64xf32, #tpu.memory_space<vmem>>, %arg4: memref<8x72xf32, #tpu.memory_space<vmem>>, %arg5: memref<8x72xf32, #tpu.memory_space<vmem>>, %arg6: memref<8x1xf32, #tpu.memory_space<vmem>>, %arg7: memref<8x10xf32, #tpu.memory_space<vmem>>, %arg8: memref<2x256xf32, #tpu.memory_space<vmem>>, %arg9: memref<2x8x256xf32, #tpu.memory_space<vmem>>, %arg10: memref<8x1xf32, #tpu.memory_space<vmem>>, %arg11: memref<8x1xf32, #tpu.memory_space<vmem>>) attributes {dimension_semantics = [#tpu.dimension_semantics<arbitrary>], iteration_bounds = array<i64: 2>, scalar_prefetch = 0 : i64, scratch_operands = 3 : i64, tpu.core_type = #tpu.core_type<tc>, window_params = [{transform_indices = @transform_0, window_bounds = array<i64: 1, 64, 256>}, {pipeline_mode = #tpu.pipeline_mode<synchronous>, transform_indices = @transform_1, window_bounds = array<i64: 72, 256>}, {pipeline_mode = #tpu.pipeline_mode<synchronous>, transform_indices = @transform_2, window_bounds = array<i64: 8, 64>}, {pipeline_mode = #tpu.pipeline_mode<synchronous>, transform_indices = @transform_3, window_bounds = array<i64: 8, 72>}, {pipeline_mode = #tpu.pipeline_mode<synchronous>, transform_indices = @transform_4, window_bounds = array<i64: 8, 72>}, {pipeline_mode = #tpu.pipeline_mode<synchronous>, transform_indices = @transform_5, window_bounds = array<i64: 8, 1>}, {pipeline_mode = #tpu.pipeline_mode<synchronous>, transform_indices = @transform_6, window_bounds = array<i64: 8, 10>}, {pipeline_mode = #tpu.pipeline_mode<synchronous>, transform_indices = @transform_7, window_bounds = array<i64: 2, 256>}]} {
    %c0 = arith.constant 0 : index
    %c0_0 = arith.constant 0 : index
    %0 = vector.load %arg7[%c0, %c0_0] : memref<8x10xf32, #tpu.memory_space<vmem>>, vector<8x10xf32>
    %1 = vector.extract_strided_slice %0 {offsets = [0, 0], sizes = [8, 1], strides = [1, 1]} : vector<8x10xf32> to vector<8x1xf32>
    %2 = vector.extract_strided_slice %0 {offsets = [0, 1], sizes = [8, 1], strides = [1, 1]} : vector<8x10xf32> to vector<8x1xf32>
    %c0_1 = arith.constant 0 : index
    %c0_2 = arith.constant 0 : index
    %3 = vector.load %arg2[%c0_1, %c0_2] : memref<72x256xf32, #tpu.memory_space<vmem>>, vector<72x256xf32>
    %c0_i32 = arith.constant 0 : i32
    %4 = arith.cmpi eq, %arg0, %c0_i32 : i32
    %5 = arith.extui %4 : i1 to i32
    %c0_i32_3 = arith.constant 0 : i32
    %6 = arith.cmpi ne, %5, %c0_i32_3 : i32
    scf.if %6 {
      %cst_25 = arith.constant 0.000000e+00 : f32
      %45 = vector.broadcast %cst_25 : f32 to vector<8x1xf32>
      %c0_26 = arith.constant 0 : index
      %c0_27 = arith.constant 0 : index
      %46 = vector.load %arg10[%c0_26, %c0_27] : memref<8x1xf32, #tpu.memory_space<vmem>>, vector<8x1xf32>
      tpu.vector_store %arg10[%c0_26, %c0_27], %45 {strides = array<i32>} : memref<8x1xf32, #tpu.memory_space<vmem>>, vector<8x1xf32>,
      %cst_28 = arith.constant 0.000000e+00 : f32
      %47 = vector.broadcast %cst_28 : f32 to vector<8x1xf32>
      %c0_29 = arith.constant 0 : index
      %c0_30 = arith.constant 0 : index
      %48 = vector.load %arg11[%c0_29, %c0_30] : memref<8x1xf32, #tpu.memory_space<vmem>>, vector<8x1xf32>
      tpu.vector_store %arg11[%c0_29, %c0_30], %47 {strides = array<i32>} : memref<8x1xf32, #tpu.memory_space<vmem>>, vector<8x1xf32>,
    } else {
    }
    %c0_4 = arith.constant 0 : index
    %c0_5 = arith.constant 0 : index
    %7 = vector.load %arg3[%c0_4, %c0_5] : memref<8x64xf32, #tpu.memory_space<vmem>>, vector<8x64xf32>
    %c0_6 = arith.constant 0 : index
    %c0_7 = arith.constant 0 : index
    %c0_8 = arith.constant 0 : index
    %8 = vector.load %arg1[%c0_6, %c0_7, %c0_8] : memref<1x64x256xf32, #tpu.memory_space<vmem>>, vector<1x64x256xf32>
    %9 = vector.shape_cast %8 : vector<1x64x256xf32> to vector<64x256xf32>
    %cst = arith.constant dense<0.000000e+00> : vector<8x256xf32>
    %10 = tpu.matmul %7, %9, %cst {dimension_numbers = #tpu.dot_dimension_numbers<[1], [0], [0], [1], [0, 0, 1, 1], [], []>} : vector<8x64xf32>, vector<64x256xf32>, vector<8x256xf32> -> vector<8x256xf32>
    %11 = vector.broadcast %1 : vector<8x1xf32> to vector<8x256xf32>
    %12 = arith.addf %10, %11 : vector<8x256xf32>
    %c0_9 = arith.constant 0 : index
    %c0_10 = arith.constant 0 : index
    %13 = vector.load %arg4[%c0_9, %c0_10] : memref<8x72xf32, #tpu.memory_space<vmem>>, vector<8x72xf32>
    %c68_i32 = arith.constant 68 : i32
    %14 = tpu.dynamic_rotate %12 by %c68_i32 dim 1 : vector<8x256xf32>, i32 -> vector<8x256xf32>
    %c64_i32 = arith.constant 64 : i32
    %15 = tpu.dynamic_rotate %12 by %c64_i32 dim 1 : vector<8x256xf32>, i32 -> vector<8x256xf32>
    %c60_i32 = arith.constant 60 : i32
    %16 = tpu.dynamic_rotate %12 by %c60_i32 dim 1 : vector<8x256xf32>, i32 -> vector<8x256xf32>
    %c4_i32 = arith.constant 4 : i32
    %17 = tpu.dynamic_rotate %12 by %c4_i32 dim 1 : vector<8x256xf32>, i32 -> vector<8x256xf32>
    %c252_i32 = arith.constant 252 : i32
    %18 = tpu.dynamic_rotate %12 by %c252_i32 dim 1 : vector<8x256xf32>, i32 -> vector<8x256xf32>
    %c196_i32 = arith.constant 196 : i32
    %19 = tpu.dynamic_rotate %12 by %c196_i32 dim 1 : vector<8x256xf32>, i32 -> vector<8x256xf32>
    %c192_i32 = arith.constant 192 : i32
    %20 = tpu.dynamic_rotate %12 by %c192_i32 dim 1 : vector<8x256xf32>, i32 -> vector<8x256xf32>
    %c188_i32 = arith.constant 188 : i32
    %21 = tpu.dynamic_rotate %12 by %c188_i32 dim 1 : vector<8x256xf32>, i32 -> vector<8x256xf32>
    %22 = tpu.concatenate %14, %15, %16, %17, %12, %18, %19, %20, %21 in 0 : vector<8x256xf32>, vector<8x256xf32>, vector<8x256xf32>, vector<8x256xf32>, vector<8x256xf32>, vector<8x256xf32>, vector<8x256xf32>, vector<8x256xf32>, vector<8x256xf32> -> vector<72x256xf32>
    %23 = arith.mulf %22, %3 : vector<72x256xf32>
    %cst_11 = arith.constant dense<0.000000e+00> : vector<8x256xf32>
    %24 = tpu.matmul %13, %23, %cst_11 {dimension_numbers = #tpu.dot_dimension_numbers<[1], [0], [0], [1], [0, 0, 1, 1], [], []>} : vector<8x72xf32>, vector<72x256xf32>, vector<8x256xf32> -> vector<8x256xf32>
    %25 = vector.broadcast %2 : vector<8x1xf32> to vector<8x256xf32>
    %26 = arith.addf %24, %25 : vector<8x256xf32>
    %27 = arith.index_cast %arg0 : i32 to index
    %c0_12 = arith.constant 0 : index
    %c0_13 = arith.constant 0 : index
    %28 = vector.load %arg9[%27, %c0_12, %c0_13] : memref<2x8x256xf32, #tpu.memory_space<vmem>>, vector<1x8x256xf32>
    %29 = vector.shape_cast %28 : vector<1x8x256xf32> to vector<8x256xf32>
    %30 = vector.shape_cast %26 : vector<8x256xf32> to vector<1x8x256xf32>
    tpu.vector_store %arg9[%27, %c0_12, %c0_13], %30 {strides = array<i32>} : memref<2x8x256xf32, #tpu.memory_space<vmem>>, vector<1x8x256xf32>,
    %c0_14 = arith.constant 0 : index
    %c0_15 = arith.constant 0 : index
    %31 = vector.load %arg10[%c0_14, %c0_15] : memref<8x1xf32, #tpu.memory_space<vmem>>, vector<8x1xf32>
    %cst_16 = arith.constant dense<0.000000e+00> : vector<8xf32>
    %32 = vector.multi_reduction <add>, %26, %cst_16 [1] : vector<8x256xf32> to vector<8xf32>
    %33 = vector.shape_cast %32 : vector<8xf32> to vector<8x1xf32>
    %34 = arith.addf %31, %33 : vector<8x1xf32>
    %c0_17 = arith.constant 0 : index
    %c0_18 = arith.constant 0 : index
    %35 = vector.load %arg10[%c0_17, %c0_18] : memref<8x1xf32, #tpu.memory_space<vmem>>, vector<8x1xf32>
    tpu.vector_store %arg10[%c0_17, %c0_18], %34 {strides = array<i32>} : memref<8x1xf32, #tpu.memory_space<vmem>>, vector<8x1xf32>,
    %c0_19 = arith.constant 0 : index
    %c0_20 = arith.constant 0 : index
    %36 = vector.load %arg11[%c0_19, %c0_20] : memref<8x1xf32, #tpu.memory_space<vmem>>, vector<8x1xf32>
    %37 = arith.mulf %26, %26 : vector<8x256xf32>
    %cst_21 = arith.constant dense<0.000000e+00> : vector<8xf32>
    %38 = vector.multi_reduction <add>, %37, %cst_21 [1] : vector<8x256xf32> to vector<8xf32>
    %39 = vector.shape_cast %38 : vector<8xf32> to vector<8x1xf32>
    %40 = arith.addf %36, %39 : vector<8x1xf32>
    %c0_22 = arith.constant 0 : index
    %c0_23 = arith.constant 0 : index
    %41 = vector.load %arg11[%c0_22, %c0_23] : memref<8x1xf32, #tpu.memory_space<vmem>>, vector<8x1xf32>
    tpu.vector_store %arg11[%c0_22, %c0_23], %40 {strides = array<i32>} : memref<8x1xf32, #tpu.memory_space<vmem>>, vector<8x1xf32>,
    %c1_i32 = arith.constant 1 : i32
    %42 = arith.cmpi eq, %arg0, %c1_i32 : i32
    %43 = arith.extui %42 : i1 to i32
    %c0_i32_24 = arith.constant 0 : i32
    %44 = arith.cmpi ne, %43, %c0_i32_24 : i32
    scf.if %44 {
      %45 = vector.extract_strided_slice %0 {offsets = [0, 2], sizes = [8, 1], strides = [1, 1]} : vector<8x10xf32> to vector<8x1xf32>
      %46 = vector.extract_strided_slice %0 {offsets = [0, 3], sizes = [8, 1], strides = [1, 1]} : vector<8x10xf32> to vector<8x1xf32>
      %47 = vector.extract_strided_slice %0 {offsets = [0, 4], sizes = [8, 1], strides = [1, 1]} : vector<8x10xf32> to vector<8x1xf32>
      %48 = vector.extract_strided_slice %0 {offsets = [0, 5], sizes = [8, 1], strides = [1, 1]} : vector<8x10xf32> to vector<8x1xf32>
      %49 = vector.extract_strided_slice %0 {offsets = [0, 6], sizes = [8, 1], strides = [1, 1]} : vector<8x10xf32> to vector<8x1xf32>
      %50 = vector.extract_strided_slice %0 {offsets = [0, 7], sizes = [1, 1], strides = [1, 1]} : vector<8x10xf32> to vector<1x1xf32>
      %51 = vector.extract_strided_slice %0 {offsets = [0, 8], sizes = [1, 1], strides = [1, 1]} : vector<8x10xf32> to vector<1x1xf32>
      %52 = vector.extract_strided_slice %0 {offsets = [0, 9], sizes = [1, 1], strides = [1, 1]} : vector<8x10xf32> to vector<1x1xf32>
      %c0_25 = arith.constant 0 : index
      %c0_26 = arith.constant 0 : index
      %53 = vector.load %arg10[%c0_25, %c0_26] : memref<8x1xf32, #tpu.memory_space<vmem>>, vector<8x1xf32>
      %c0_27 = arith.constant 0 : index
      %c0_28 = arith.constant 0 : index
      %54 = vector.load %arg11[%c0_27, %c0_28] : memref<8x1xf32, #tpu.memory_space<vmem>>, vector<8x1xf32>
      %cst_29 = arith.constant 5.120000e+02 : f32
      %55 = vector.broadcast %cst_29 : f32 to vector<8x1xf32>
      %56 = arith.divf %53, %55 : vector<8x1xf32>
      %cst_30 = arith.constant 5.120000e+02 : f32
      %57 = vector.broadcast %cst_30 : f32 to vector<8x1xf32>
      %58 = arith.divf %54, %57 : vector<8x1xf32>
      %59 = arith.mulf %56, %56 : vector<8x1xf32>
      %60 = arith.subf %58, %59 : vector<8x1xf32>
      %cst_31 = arith.constant 9.99999974E-6 : f32
      %61 = vector.broadcast %cst_31 : f32 to vector<8x1xf32>
      %62 = arith.addf %60, %61 : vector<8x1xf32>
      %63 = math.rsqrt %62 : vector<8x1xf32>
      %64 = arith.mulf %45, %63 : vector<8x1xf32>
      %65 = arith.mulf %56, %64 : vector<8x1xf32>
      %66 = arith.subf %46, %65 : vector<8x1xf32>
      %c0_32 = arith.constant 0 : index
      %c0_33 = arith.constant 0 : index
      %67 = vector.load %arg5[%c0_32, %c0_33] : memref<8x72xf32, #tpu.memory_space<vmem>>, vector<8x72xf32>
      %cst_34 = arith.constant 0.000000e+00 : f32
      %68 = vector.broadcast %cst_34 : f32 to vector<8x1xf32>
      %c0_i32_35 = arith.constant 0 : i32
      %c2_i32 = arith.constant 2 : i32
      %69 = arith.addi %c0_i32_35, %c2_i32 : i32
      %c1_i32_36 = arith.constant 1 : i32
      %70:2 = scf.for %arg12 = %c0_i32_35 to %69 step %c1_i32_36 iter_args(%arg13 = %68, %arg14 = %68) -> (vector<8x1xf32>, vector<8x1xf32>)  : i32 {
        %105 = arith.index_cast %arg12 : i32 to index
        %c0_55 = arith.constant 0 : index
        %c0_56 = arith.constant 0 : index
        %106 = vector.load %arg9[%105, %c0_55, %c0_56] : memref<2x8x256xf32, #tpu.memory_space<vmem>>, vector<1x8x256xf32>
        %107 = vector.shape_cast %106 : vector<1x8x256xf32> to vector<8x256xf32>
        %108 = vector.broadcast %64 : vector<8x1xf32> to vector<8x256xf32>
        %109 = arith.mulf %107, %108 : vector<8x256xf32>
        %110 = vector.broadcast %66 : vector<8x1xf32> to vector<8x256xf32>
        %111 = arith.addf %109, %110 : vector<8x256xf32>
        %cst_57 = arith.constant 0.000000e+00 : f32
        %112 = vector.broadcast %cst_57 : f32 to vector<8x256xf32>
        %113 = arith.maximumf %111, %112 : vector<8x256xf32>
        %c68_i32_58 = arith.constant 68 : i32
        %114 = tpu.dynamic_rotate %113 by %c68_i32_58 dim 1 : vector<8x256xf32>, i32 -> vector<8x256xf32>
        %c64_i32_59 = arith.constant 64 : i32
        %115 = tpu.dynamic_rotate %113 by %c64_i32_59 dim 1 : vector<8x256xf32>, i32 -> vector<8x256xf32>
        %c60_i32_60 = arith.constant 60 : i32
        %116 = tpu.dynamic_rotate %113 by %c60_i32_60 dim 1 : vector<8x256xf32>, i32 -> vector<8x256xf32>
        %c4_i32_61 = arith.constant 4 : i32
        %117 = tpu.dynamic_rotate %113 by %c4_i32_61 dim 1 : vector<8x256xf32>, i32 -> vector<8x256xf32>
        %c252_i32_62 = arith.constant 252 : i32
        %118 = tpu.dynamic_rotate %113 by %c252_i32_62 dim 1 : vector<8x256xf32>, i32 -> vector<8x256xf32>
        %c196_i32_63 = arith.constant 196 : i32
        %119 = tpu.dynamic_rotate %113 by %c196_i32_63 dim 1 : vector<8x256xf32>, i32 -> vector<8x256xf32>
        %c192_i32_64 = arith.constant 192 : i32
        %120 = tpu.dynamic_rotate %113 by %c192_i32_64 dim 1 : vector<8x256xf32>, i32 -> vector<8x256xf32>
        %c188_i32_65 = arith.constant 188 : i32
        %121 = tpu.dynamic_rotate %113 by %c188_i32_65 dim 1 : vector<8x256xf32>, i32 -> vector<8x256xf32>
        %122 = tpu.concatenate %114, %115, %116, %117, %113, %118, %119, %120, %121 in 0 : vector<8x256xf32>, vector<8x256xf32>, vector<8x256xf32>, vector<8x256xf32>, vector<8x256xf32>, vector<8x256xf32>, vector<8x256xf32>, vector<8x256xf32>, vector<8x256xf32> -> vector<72x256xf32>
        %123 = arith.mulf %122, %3 : vector<72x256xf32>
        %cst_66 = arith.constant dense<0.000000e+00> : vector<8x256xf32>
        %124 = tpu.matmul %67, %123, %cst_66 {dimension_numbers = #tpu.dot_dimension_numbers<[1], [0], [0], [1], [0, 0, 1, 1], [], []>} : vector<8x72xf32>, vector<72x256xf32>, vector<8x256xf32> -> vector<8x256xf32>
        %125 = vector.broadcast %47 : vector<8x1xf32> to vector<8x256xf32>
        %126 = arith.addf %124, %125 : vector<8x256xf32>
        %127 = arith.index_cast %arg12 : i32 to index
        %c0_67 = arith.constant 0 : index
        %c0_68 = arith.constant 0 : index
        %128 = vector.load %arg9[%127, %c0_67, %c0_68] : memref<2x8x256xf32, #tpu.memory_space<vmem>>, vector<1x8x256xf32>
        %129 = vector.shape_cast %128 : vector<1x8x256xf32> to vector<8x256xf32>
        %130 = vector.shape_cast %126 : vector<8x256xf32> to vector<1x8x256xf32>
        tpu.vector_store %arg9[%127, %c0_67, %c0_68], %130 {strides = array<i32>} : memref<2x8x256xf32, #tpu.memory_space<vmem>>, vector<1x8x256xf32>,
        %cst_69 = arith.constant dense<0.000000e+00> : vector<8xf32>
        %131 = vector.multi_reduction <add>, %126, %cst_69 [1] : vector<8x256xf32> to vector<8xf32>
        %132 = vector.shape_cast %131 : vector<8xf32> to vector<8x1xf32>
        %133 = arith.addf %arg13, %132 : vector<8x1xf32>
        %134 = arith.mulf %126, %126 : vector<8x256xf32>
        %cst_70 = arith.constant dense<0.000000e+00> : vector<8xf32>
        %135 = vector.multi_reduction <add>, %134, %cst_70 [1] : vector<8x256xf32> to vector<8xf32>
        %136 = vector.shape_cast %135 : vector<8xf32> to vector<8x1xf32>
        %137 = arith.addf %arg14, %136 : vector<8x1xf32>
        scf.yield %133, %137 : vector<8x1xf32>, vector<8x1xf32>
      }
      %c2_i32_37 = arith.constant 2 : i32
      %cst_38 = arith.constant 5.120000e+02 : f32
      %71 = vector.broadcast %cst_38 : f32 to vector<8x1xf32>
      %72 = arith.divf %70#0, %71 : vector<8x1xf32>
      %cst_39 = arith.constant 5.120000e+02 : f32
      %73 = vector.broadcast %cst_39 : f32 to vector<8x1xf32>
      %74 = arith.divf %70#1, %73 : vector<8x1xf32>
      %75 = arith.mulf %72, %72 : vector<8x1xf32>
      %76 = arith.subf %74, %75 : vector<8x1xf32>
      %cst_40 = arith.constant 9.99999974E-6 : f32
      %77 = vector.broadcast %cst_40 : f32 to vector<8x1xf32>
      %78 = arith.addf %76, %77 : vector<8x1xf32>
      %79 = math.rsqrt %78 : vector<8x1xf32>
      %80 = arith.mulf %48, %79 : vector<8x1xf32>
      %81 = arith.mulf %72, %80 : vector<8x1xf32>
      %82 = arith.subf %49, %81 : vector<8x1xf32>
      %c0_41 = arith.constant 0 : index
      %c0_42 = arith.constant 0 : index
      %83 = vector.load %arg6[%c0_41, %c0_42] : memref<8x1xf32, #tpu.memory_space<vmem>>, vector<8x1xf32>
      %cst_43 = arith.constant 0.000000e+00 : f32
      %84 = vector.broadcast %cst_43 : f32 to vector<1x1xf32>
      %c0_i32_44 = arith.constant 0 : i32
      %c2_i32_45 = arith.constant 2 : i32
      %85 = arith.addi %c0_i32_44, %c2_i32_45 : i32
      %c1_i32_46 = arith.constant 1 : i32
      %86:2 = scf.for %arg12 = %c0_i32_44 to %85 step %c1_i32_46 iter_args(%arg13 = %84, %arg14 = %84) -> (vector<1x1xf32>, vector<1x1xf32>)  : i32 {
        %105 = arith.index_cast %arg12 : i32 to index
        %c0_55 = arith.constant 0 : index
        %c0_56 = arith.constant 0 : index
        %106 = vector.load %arg9[%105, %c0_55, %c0_56] : memref<2x8x256xf32, #tpu.memory_space<vmem>>, vector<1x8x256xf32>
        %107 = vector.shape_cast %106 : vector<1x8x256xf32> to vector<8x256xf32>
        %108 = vector.broadcast %80 : vector<8x1xf32> to vector<8x256xf32>
        %109 = arith.mulf %107, %108 : vector<8x256xf32>
        %110 = vector.broadcast %82 : vector<8x1xf32> to vector<8x256xf32>
        %111 = arith.addf %109, %110 : vector<8x256xf32>
        %cst_57 = arith.constant 0.000000e+00 : f32
        %112 = vector.broadcast %cst_57 : f32 to vector<8x256xf32>
        %113 = arith.maximumf %111, %112 : vector<8x256xf32>
        %114 = vector.broadcast %83 : vector<8x1xf32> to vector<8x256xf32>
        %115 = arith.mulf %113, %114 : vector<8x256xf32>
        %cst_58 = arith.constant dense<0.000000e+00> : vector<256xf32>
        %116 = vector.multi_reduction <add>, %115, %cst_58 [0] : vector<8x256xf32> to vector<256xf32>
        %117 = vector.shape_cast %116 : vector<256xf32> to vector<1x256xf32>
        %118 = vector.broadcast %50 : vector<1x1xf32> to vector<1x256xf32>
        %119 = arith.addf %117, %118 : vector<1x256xf32>
        %120 = arith.index_cast %arg12 : i32 to index
        %c0_59 = arith.constant 0 : index
        %121 = vector.load %arg8[%120, %c0_59] : memref<2x256xf32, #tpu.memory_space<vmem>>, vector<1x256xf32>
        tpu.vector_store %arg8[%120, %c0_59], %119 {strides = array<i32>} : memref<2x256xf32, #tpu.memory_space<vmem>>, vector<1x256xf32>,
        %122 = vector.shape_cast %119 : vector<1x256xf32> to vector<1x1x256xf32>
        %cst_60 = arith.constant dense<0.000000e+00> : vector<1xf32>
        %123 = vector.multi_reduction <add>, %122, %cst_60 [1, 2] : vector<1x1x256xf32> to vector<1xf32>
        %124 = vector.shape_cast %123 : vector<1xf32> to vector<1x1x1xf32>
        %125 = vector.extract %124[0, 0, 0] : f32 from vector<1x1x1xf32>
        %126 = vector.broadcast %125 : f32 to vector<1x1xf32>
        %127 = arith.addf %arg13, %126 : vector<1x1xf32>
        %128 = arith.mulf %119, %119 : vector<1x256xf32>
        %129 = vector.shape_cast %128 : vector<1x256xf32> to vector<1x1x256xf32>
        %cst_61 = arith.constant dense<0.000000e+00> : vector<1xf32>
        %130 = vector.multi_reduction <add>, %129, %cst_61 [1, 2] : vector<1x1x256xf32> to vector<1xf32>
        %131 = vector.shape_cast %130 : vector<1xf32> to vector<1x1x1xf32>
        %132 = vector.extract %131[0, 0, 0] : f32 from vector<1x1x1xf32>
        %133 = vector.broadcast %132 : f32 to vector<1x1xf32>
        %134 = arith.addf %arg14, %133 : vector<1x1xf32>
        scf.yield %127, %134 : vector<1x1xf32>, vector<1x1xf32>
      }
      %c2_i32_47 = arith.constant 2 : i32
      %cst_48 = arith.constant 5.120000e+02 : f32
      %87 = vector.broadcast %cst_48 : f32 to vector<1x1xf32>
      %88 = arith.divf %86#0, %87 : vector<1x1xf32>
      %cst_49 = arith.constant 5.120000e+02 : f32
      %89 = vector.broadcast %cst_49 : f32 to vector<1x1xf32>
      %90 = arith.divf %86#1, %89 : vector<1x1xf32>
      %91 = arith.mulf %88, %88 : vector<1x1xf32>
      %92 = arith.subf %90, %91 : vector<1x1xf32>
      %cst_50 = arith.constant 9.99999974E-6 : f32
      %93 = vector.broadcast %cst_50 : f32 to vector<1x1xf32>
      %94 = arith.addf %92, %93 : vector<1x1xf32>
      %95 = math.rsqrt %94 : vector<1x1xf32>
      %96 = arith.mulf %51, %95 : vector<1x1xf32>
      %97 = arith.mulf %88, %96 : vector<1x1xf32>
      %98 = arith.subf %52, %97 : vector<1x1xf32>
      %c0_51 = arith.constant 0 : index
      %c0_52 = arith.constant 0 : index
      %99 = vector.load %arg8[%c0_51, %c0_52] : memref<2x256xf32, #tpu.memory_space<vmem>>, vector<2x256xf32>
      %100 = vector.broadcast %96 : vector<1x1xf32> to vector<2x256xf32>
      %101 = arith.mulf %99, %100 : vector<2x256xf32>
      %102 = vector.broadcast %98 : vector<1x1xf32> to vector<2x256xf32>
      %103 = arith.addf %101, %102 : vector<2x256xf32>
      %c0_53 = arith.constant 0 : index
      %c0_54 = arith.constant 0 : index
      %104 = vector.load %arg8[%c0_53, %c0_54] : memref<2x256xf32, #tpu.memory_space<vmem>>, vector<2x256xf32>
      tpu.vector_store %arg8[%c0_53, %c0_54], %103 {strides = array<i32>} : memref<2x256xf32, #tpu.memory_space<vmem>>, vector<2x256xf32>,
    } else {
    }
    return
  }
  func.func @transform_0(%arg0: i32) -> (i32, i32, i32) {
    %c0_i32 = arith.constant 0 : i32
    %c0_i32_0 = arith.constant 0 : i32
    %c0_i32_1 = arith.constant 0 : i32
    return %arg0, %c0_i32, %c0_i32_0 : i32, i32, i32
  }
  func.func @transform_1(%arg0: i32) -> (i32, i32) {
    %c0_i32 = arith.constant 0 : i32
    %c0_i32_0 = arith.constant 0 : i32
    %c0_i32_1 = arith.constant 0 : i32
    return %c0_i32, %c0_i32_0 : i32, i32
  }
  func.func @transform_2(%arg0: i32) -> (i32, i32) {
    %c0_i32 = arith.constant 0 : i32
    %c0_i32_0 = arith.constant 0 : i32
    %c0_i32_1 = arith.constant 0 : i32
    return %c0_i32, %c0_i32_0 : i32, i32
  }
  func.func @transform_3(%arg0: i32) -> (i32, i32) {
    %c0_i32 = arith.constant 0 : i32
    %c0_i32_0 = arith.constant 0 : i32
    %c0_i32_1 = arith.constant 0 : i32
    return %c0_i32, %c0_i32_0 : i32, i32
  }
  func.func @transform_4(%arg0: i32) -> (i32, i32) {
    %c0_i32 = arith.constant 0 : i32
    %c0_i32_0 = arith.constant 0 : i32
    %c0_i32_1 = arith.constant 0 : i32
    return %c0_i32, %c0_i32_0 : i32, i32
  }
  func.func @transform_5(%arg0: i32) -> (i32, i32) {
    %c0_i32 = arith.constant 0 : i32
    %c0_i32_0 = arith.constant 0 : i32
    %c0_i32_1 = arith.constant 0 : i32
    return %c0_i32, %c0_i32_0 : i32, i32
  }
  func.func @transform_6(%arg0: i32) -> (i32, i32) {
    %c0_i32 = arith.constant 0 : i32
    %c0_i32_0 = arith.constant 0 : i32
    %c0_i32_1 = arith.constant 0 : i32
    return %c0_i32, %c0_i32_0 : i32, i32
  }
  func.func @transform_7(%arg0: i32) -> (i32, i32) {
    %c0_i32 = arith.constant 0 : i32
    %c0_i32_0 = arith.constant 0 : i32
    %c0_i32_1 = arith.constant 0 : i32
    return %c0_i32, %c0_i32_0 : i32, i32
  }
}

</mosaic_0001>

<bundles_post_ra>
// kernel: tpu_custom_call.1
= control target key start
LH: loop header
LB: loop body
LE: loop exit
PB: predicated region body
PF: predicated region fallthrough
CT: control target
= control target key end

     0   :  { %12 = vsyncpa [#allocation6], 0  ;;  %s2048_s0 = inlined_call_operand.hbm [shape: f32[2,64,256], index: 0, kind: input, shape index: {}]   ;;  %s2049_s1 = inlined_call_operand.hbm [shape: f32[72,256], index: 1, kind: input, shape index: {}]   ;;  %s2050_s2 = inlined_call_operand.vmem [shape: f32[8,64], index: 2, kind: input, shape index: {}]   ;;  %s2051_s3 = inlined_call_operand.vmem [shape: f32[8,72], index: 3, kind: input, shape index: {}]   ;;  %s2052_s4 = inlined_call_operand.vmem [shape: f32[8,72], index: 4, kind: input, shape index: {}]   ;;  %s2053_s5 = inlined_call_operand.vmem [shape: f32[8,1], index: 5, kind: input, shape index: {}]   ;;  %s2054_s6 = inlined_call_operand.hbm [shape: f32[8,10], index: 6, kind: input, shape index: {}]   ;;  %s2055_s7 = inlined_call_operand.hbm [shape: f32[2,256], index: 7, kind: output, shape index: {}]  }
   0x1   :  { %14 = vsyncpa [#allocation6 + $0x1], 0 }
   0x2   :  { %15 = vsyncpa [#allocation9], 0 }
   0x3   :  { %16 = vsyncpa [#allocation7], 0  ;;  %s1584_s24 = smov 0   ;;  %s1586_s25 = smov 0  }
   0x4   :  { %s1588_s26 = smov 0   ;;  %s1590_s27 = smov 0  }
   0x5 LB: > { %s1603_s28 = sadd.s32 4294967295, %s1483_s27   ;;  %p42_p0 = scmp.ne.s32.totalorder %s1475_s25, %s1471_s24  ;;  %s1483_s27 = sphi %s1590_s27, %s2075_s27   ;;  %s1479_s26 = sphi %s1588_s26, %s2074_s26   ;;  %s1475_s25 = sphi %s1586_s25, %s2073_s25   ;;  %s1471_s24 = sphi %s1584_s24, %s2072_s24  }
   0x6   : > { %p2056_p1 = scmp.eq.s32.totalorder %s1603_s28, 0  ;;  %p1052_p2 = scmp.ge.s32.totalorder %s1483_s27, 1 }
   0x7   : > { %p200_p3 = scmp.lt.s32.totalorder %s1483_s27, 3  ;;  %s1509_s8 = smov [#allocation8]  }
   0x8   : > { %p1612_p5 = por %p2056_p1, %p42_p0  ;;  %s212_s9 = sshll.u32 %s1509_s8, 4  ;;  %s213_s9 = int_to_ptr.vmem [resolvable:$true] %s212_s9 }
   0x9   : > { %p1616_p6 = pnand %p1052_p2, %p200_p3  ;;  %s1510_s11 = smov [#allocation10]  }
   0xa   : > { %s2059_s29 = scalar_select %p1612_p5, 1, 0 }
   0xb   : > { %s2060_s30 = scalar_select %p1616_p6, 1, 0 }
   0xc   : > { %p1155_p7 = pneg %p1616_p6  ;;  %s238_s12 = sshll.u32 %s1510_s11, 4  ;;  %s1628_s12 = int_to_ptr.vmem [resolvable:$true] %s238_s12 }
   0xd   : > { %s1305_s15 = scalar_lea.hbm %s2049_s1, 2304 }
   0xe   : > { %p1624_p8 = pnand %p1155_p7, %p2056_p1  ;;  %p1306_p9 = scmp.ne.s32.totalorder %s2049_s1, %s1305_s15 }
   0xf   : > { %p1312_p13 = scmp.lt.u32.totalorder %s1305_s15, %s2049_s1 }
  0x10   : > { %p1307_p10 = pneg %p1624_p8 }
  0x12   : > { %p1308_p11 = pnand %p1307_p10, %p1306_p9 }
  0x14   : > { %p1309_p12 = pneg %p1308_p11 }
  0x16   : > { %p1314_p0 = pnand %p1312_p13, %p1309_p12 }
  0x18   : > { %1317 = shalt.err (!%p1314_p0)
}
  0x19   : > { %s1318_s20 = scalar_lea.vmem %s213_s9, 2304  ;;  %p1326_p4 = scmp.lt.s32.totalorder %s213_s9, %s213_s9 }
  0x1a   : > { %p1319_p2 = scmp.ne.s32.totalorder %s213_s9, %s1318_s20  ;;  %p1327_p1 = scmp.lt.s32.totalorder %s1318_s20, %s1318_s20 }
  0x1c   : > { %p1321_p3 = pnand %p1319_p2, %p1307_p10  ;;  %p1328_p5 = por %p1327_p1, %p1326_p4 }
  0x1e   : > { %p1322_p7 = pneg %p1321_p3 }
  0x20   : > { %p1329_p6 = pnand %p1328_p5, %p1322_p7 }
  0x22   : > { %1332 = shalt.err (!%p1329_p6)
}
  0x23   : > { %s1511_s21 = smov 256   ;;  %s1512_s22 = smov 16  }
  0x24   : > { %1158 = dma.hbm_to_vmem [thread:$0]  (!%p1624_p8), %s2049_s1, 2304, %s213_s9, [#allocation9], %s1511_s21, %s1511_s21, %s1512_s22  }
  0x25   : > { %s1333_s13 = scalar_lea.hbm %s2054_s6, 128 }
  0x26   : > { %p1334_p1 = scmp.ne.s32.totalorder %s2054_s6, %s1333_s13  ;;  %p1340_p6 = scmp.lt.u32.totalorder %s1333_s13, %s2054_s6 }
  0x28   : > { %p1336_p4 = pnand %p1334_p1, %p1307_p10 }
  0x2a   : > { %p1337_p5 = pneg %p1336_p4 }
  0x2c   : > { %p1342_p9 = pnand %p1340_p6, %p1337_p5 }
  0x2e   : > { %1345 = shalt.err (!%p1342_p9)
}
  0x2f   : > { %s1346_s9 = scalar_lea.vmem %s1628_s12, 128  ;;  %p1354_p0 = scmp.lt.s32.totalorder %s1628_s12, %s1628_s12 }
  0x30   : > { %p1347_p11 = scmp.ne.s32.totalorder %s1628_s12, %s1346_s9  ;;  %p1355_p2 = scmp.lt.s32.totalorder %s1346_s9, %s1346_s9 }
  0x32   : > { %p1349_p12 = pnand %p1347_p11, %p1307_p10  ;;  %p1356_p3 = por %p1355_p2, %p1354_p0 }
  0x34   : > { %p1350_p13 = pneg %p1349_p12 }
  0x36   : > { %p1357_p7 = pnand %p1356_p3, %p1350_p13 }
  0x38   : > { %1360 = shalt.err (!%p1357_p7)
}
  0x39   : > { %1161 = dma.hbm_to_vmem [thread:$0]  (!%p1624_p8), %s2054_s6, 128, %s1628_s12, [#allocation9]  }
  0x3a   : > { %s1681_s20 = sadd.s32 1, %s1483_s27   ;;  %s29_s23 = sadd.s32 1, %s1479_s26 }
  0x3b   : > { %s26_s10 = ssub.s32 %s1483_s27, %s1681_s20  ;;  %p36_p10 = scmp.ne.s32.totalorder %s1479_s26, %s1475_s25 }
  0x3c   : > { %p27_p1 = scmp.eq.s32.totalorder %s26_s10, 0  ;;  %p37_p4 = scmp.eq.s32.totalorder %s1483_s27, 0 }
  0x3d   : > { %p1168_p5 = scmp.lt.s32.totalorder %s1483_s27, 2  ;;  %s249_s24 = sand.u32 1, %s1479_s26  }
  0x3e   : > { %s1692_s8 = scalar_select %p27_p1, %s1479_s26, %s29_s23  }
  0x3f   : > { %p38_p6 = por %p37_p4, %p36_p10  ;;  %s1056_s11 = sshll.u32 %s249_s24, 7 }
  0x40   : > { %s1080_s13 = sshll.u32 %s1483_s27, 11  ;;  %s253_s12 = scalar_lea.vmem [#allocation5], %s1056_s11 }
  0x41   : > { %s1698_s16 = scalar_lea.hbm %s2048_s0, %s1080_s13  ;;  %s260_s17 = sshll.u32 %s253_s12, 4  ;;  %s1704_s17 = int_to_ptr.vmem [resolvable:$true] %s260_s17 }
  0x42   : > { %p1700_p8 = pnand %p1168_p5, %p38_p6  ;;  %s1706_s27 = scalar_lea.sflag [#allocation6], %s249_s24 }
  0x43   : > { %s1361_s18 = scalar_lea.hbm %s1698_s16, 2048  ;;  %s1366_s10 = scalar_lea.hbm %s2048_s0, 4096 }
  0x44   : > { %p1362_p9 = scmp.ne.s32.totalorder %s1698_s16, %s1361_s18  ;;  %p1363_p11 = pneg %p1700_p8 }
  0x45   : > { %p1367_p0 = scmp.lt.u32.totalorder %s1698_s16, %s2048_s0  ;;  %p1368_p2 = scmp.lt.u32.totalorder %s1366_s10, %s1361_s18 }
  0x46   : > { %p1364_p12 = pnand %p1363_p11, %p1362_p9  ;;  %p1370_p7 = scmp.lt.u32.totalorder %s1361_s18, %s1698_s16 }
  0x47   : > { %p1369_p3 = por %p1368_p2, %p1367_p0 }
  0x48   : > { %p1365_p13 = pneg %p1364_p12 }
  0x49   : > { %p1371_p10 = por %p1370_p7, %p1369_p3 }
  0x4b   : > { %p1372_p1 = pnand %p1371_p10, %p1365_p13 }
  0x4d   : > { %1375 = shalt.err (!%p1372_p1)
}
  0x4e   : > { %s1376_s24 = scalar_lea.vmem %s1704_s17, 2048  ;;  %s1513_s14 = smov [#allocation5]  }
  0x4f   : > { %p1377_p4 = scmp.ne.s32.totalorder %s1704_s17, %s1376_s24  ;;  %s1381_s15 = sshll.u32 %s1513_s14, 4  ;;  %s1382_s15 = int_to_ptr.vmem [resolvable:$false] %s1381_s15 }
  0x50   : > { %s1383_s12 = scalar_lea.vmem %s1382_s15, 4096  ;;  %p1384_p9 = scmp.lt.s32.totalorder %s1704_s17, %s1382_s15 }
  0x51   : > { %p1379_p5 = pnand %p1377_p4, %p1363_p11  ;;  %p1385_p12 = scmp.lt.s32.totalorder %s1383_s12, %s1376_s24 }
  0x53   : > { %p1380_p6 = pneg %p1379_p5  ;;  %p1386_p0 = por %p1385_p12, %p1384_p9 }
  0x55   : > { %p1387_p2 = pnand %p1386_p0, %p1380_p6 }
  0x57   : > { %1390 = shalt.err (!%p1387_p2)
}
  0x58   : > { %1165 = dma.hbm_to_vmem [thread:$0]  (!%p1700_p8), %s1698_s16, 2048, %s1704_s17, %s1706_s27, %s1511_s21, %s1511_s21, %s1512_s22  }
  0x59   : > { %p2063_p11 = scmp.ne.s32.totalorder %s2060_s30, 0 }
  0x5a   : > { %s274_s18 = sand.u32 (!%p2063_p11), 1, %s1475_s25   ;;  %p2064_p13 = scmp.ne.s32.totalorder (!%p2063_p11), %s2059_s29, 0 }
  0x5b   : > { %272 = sbr.rel (%p2063_p11) target bundleno = 2717 (0xa9d), region = 48  ;;  %s1060_s19 = sshll.u32 (!%p2063_p11), %s274_s18, 7 }
  0x5c   : > { %s275_s23 = scalar_lea.sflag (!%p2063_p11), [#allocation6], %s274_s18  ;;  %s1740_s10 = scalar_lea.vmem (!%p2063_p11), [#allocation5], %s1060_s19 }
  0x62   : > { %1458 = dma.done.wait (%p2064_p13), %s275_s23, 2048  }
  0x63   : > { %1460 = vsyncadd (%p2064_p13), %s275_s23, 4294965248  ;;  %p2065_p3 = scmp.eq.s32.totalorder %s1603_s28, 0 }
  0x65   : > { %1462 = dma.done.wait (%p2065_p3), [#allocation9], 2432   ;;  %p2066_p8 = pmov %p2065_p3 }
  0x66   : > { %v1750_v0 = vld [vmem:[#allocation10] sm:$0xff]  ;;  %v1752_v1 = vld [vmem:[#allocation8] sm:$0xff]  ;;  %v1754_v2 = vld [vmem:[#allocation8 + $0x8] sm:$0xff]  ;;  %p2067_p7 = scmp.ne.s32.totalorder %s1603_s28, 0 }
  0x67   : > { %1464 = vsyncadd (%p2066_p8), [#allocation9], 4294964864  ;;  %v1756_v3 = vld [vmem:[#allocation8 + $0x10] sm:$0xff]  ;;  %v1758_v4 = vld [vmem:[#allocation8 + $0x18] sm:$0xff]  ;;  %vm335_vm0 = vcmask (!%p2067_p7), 7168   ;;  %v1514_v19 = vmov (!%p2067_p7), 0.0  }
  0x68   : > { %v1760_v5 = vld [vmem:[#allocation8 + $0x20] sm:$0xff]  ;;  %v1762_v6 = vld [vmem:[#allocation8 + $0x28] sm:$0xff]  ;;  %v1764_v7 = vld [vmem:[#allocation8 + $0x30] sm:$0xff]  ;;  %334 = sbr.rel (%p2067_p7) target bundleno = 111 (0x6f), region = 64  ;;  %336 = vst.msk [vmem:[#allocation3] sm:$0xff] (!%p2067_p7), %vm335_vm0, %v1514_v19 }
  0x69   : > { %v1766_v8 = vld [vmem:[#allocation8 + $0x38] sm:$0xff]  ;;  %v1768_v9 = vld [vmem:[#allocation8 + $0x40] sm:$0xff]  ;;  %v1770_v10 = vld [vmem:[#allocation8 + $0x48] sm:$0xff]  ;;  %337 = vst.msk [vmem:[#allocation4] sm:$0xff] (!%p2067_p7), %vm335_vm0, %v1514_v19 }
  0x6a   : > { %v1772_v11 = vld [vmem:[#allocation8 + $0x50] sm:$0xff]  ;;  %v1774_v12 = vld [vmem:[#allocation8 + $0x58] sm:$0xff]  ;;  %v1776_v13 = vld [vmem:[#allocation8 + $0x60] sm:$0xff] }
  0x6b   : > { %v1778_v14 = vld [vmem:[#allocation8 + $0x68] sm:$0xff]  ;;  %v1780_v15 = vld [vmem:[#allocation8 + $0x70] sm:$0xff]  ;;  %v1782_v16 = vld [vmem:[#allocation8 + $0x78] sm:$0xff] }
  0x6c   : > { %v1784_v17 = vld [vmem:[#allocation8 + $0x80] sm:$0xff]  ;;  %v1786_v18 = vld [vmem:[#allocation8 + $0x88] sm:$0xff] }
  0x6f PF: > { %v340_v20 = vld [vmem:[%s1740_s10 + $0x8] sm:$0xff]  ;;  %v342_v21 = vld [vmem:[%s1740_s10 + $0x18] sm:$0xff]  ;;  %v339_v22 = vld [vmem:[%s1740_s10] sm:$0xff]  ;;  %v1515_v27 = vmov 0.0   ;;  %v1516_v28 = vmov 0   ;;  %vm360_vm1 = vcmask 523264   ;;  %v440_v53 = vlaneseq }
  0x70   : > { %v1085_v23 = vpack.c.bf16 %v342_v21, %v340_v20  ;;  %v341_v24 = vld [vmem:[%s1740_s10 + $0x10] sm:$0xff]  ;;  %v344_v25 = vld [vmem:[%s1740_s10 + $0x28] sm:$0xff]  ;;  %v346_v26 = vld [vmem:[%s1740_s10 + $0x38] sm:$0xff]  ;;  %428 = vmatprep.mubr.f32.mxu0 %v1515_v27  ;;  %1287 = vset.pattern.permute.xlu0 %v1516_v28  ;;  %s1517_s21 = smov 64   ;;  %s1518_s22 = smov 68   ;;  %v1522_v52 = vmov 1  }
  0x71   : > { %v1087_v29 = vpack.c.bf16 %v341_v24, %v339_v22  ;;  %v1089_v30 = vpack.c.bf16 %v346_v26, %v344_v25  ;;  %v343_v31 = vld [vmem:[%s1740_s10 + $0x20] sm:$0xff]  ;;  %v345_v32 = vld [vmem:[%s1740_s10 + $0x30] sm:$0xff]  ;;  %v348_v33 = vld [vmem:[%s1740_s10 + $0x48] sm:$0xff]  ;;  %357 = vperm.xlu0 %1287, %v1750_v0   ;;  %563 = vmatprep.mubr.f32.mxu1 %v1515_v27  ;;  %s1519_s16 = smov 60   ;;  %s1520_s17 = smov 4   ;;  %v1819_v56 = vand.u32 127, %v440_v53 }
  0x72   : > { %1086 = vmatprep.subr.bf16.mxu0 %v1085_v23  ;;  %v350_v34 = vld [vmem:[%s1740_s10 + $0x58] sm:$0xff]  ;;  %v1091_v35 = vpack.c.bf16 %v345_v32, %v343_v31  ;;  %v347_v37 = vld [vmem:[%s1740_s10 + $0x40] sm:$0xff]  ;;  %v349_v38 = vld [vmem:[%s1740_s10 + $0x50] sm:$0xff]  ;;  %s1521_s9 = smov 124   ;;  %1288 = vset.pattern.permute.xlu1 %v1522_v52  ;;  %vm495_vm7 = vcmask 588800   ;;  %s1081_s13 = sshll.u32 %s1603_s28, 4 }
  0x73   : > { %1088 = vmatpush1.bf16.msra.mxu0 %v1087_v29  ;;  %v1093_v36 = vpack.c.bf16 %v350_v34, %v348_v33  ;;  %v352_v39 = vld [vmem:[%s1740_s10 + $0x68] sm:$0xff]  ;;  %v354_v40 = vld [vmem:[%s1740_s10 + $0x78] sm:$0xff]  ;;  %v1095_v41 = vpack.c.bf16 %v349_v38, %v347_v37  ;;  %v351_v43 = vld [vmem:[%s1740_s10 + $0x60] sm:$0xff]  ;;  %vm449_vm2 = vcmp.lt.s32.totalorder %v1819_v56, 64  ;;  %vm442_vm3 = vcmp.lt.s32.totalorder %v1819_v56, 68  ;;  %s572_s24 = scalar_lea.vmem [#allocation2], %s1081_s13 }
  0x74   : > { %1090 = vmatprep.subr.bf16.mxu0 %v1089_v30  ;;  %v1097_v42 = vpack.c.bf16 %v354_v40, %v352_v39  ;;  %v353_v44 = vld [vmem:[%s1740_s10 + $0x70] sm:$0xff]  ;;  %vm456_vm4 = vcmp.lt.s32.totalorder %v1819_v56, 60  ;;  %vm463_vm5 = vcmp.lt.s32.totalorder %v1819_v56, 4  ;;  %vm470_vm6 = vcmp.lt.s32.totalorder %v1819_v56, 124  ;;  %p1068_p10 = scmp.ne.s32.totalorder %s1603_s28, 1 }
  0x75   : > { %v1099_v45 = vpack.c.bf16 %v353_v44, %v351_v43  ;;  %v338_v46 = vld [vmem:[%s2050_s2] sm:$0xff]  ;;  %1289 = vset.pattern.permute.xlu0 %v1522_v52  ;;  %vm580_vm8 = vcmask 7168   ;;  %s1523_s14 = smov (!%p1068_p10), 2   ;;  %s1524_s15 = smov (!%p1068_p10), 126  }
  0x76   : > { %s1525_s19 = smov (!%p1068_p10), 3   ;;  %s1888_s23 = smov (!%p1068_p10), 0  }
  0x77   : > { %1092 = vmatpush1.bf16.msra.mxu0 %v1091_v35 }
  0x78   : > { %1094 = vmatprep.subr.bf16.mxu0 %v1093_v36 }
  0x7b   : > { %1096 = vmatpush1.bf16.msra.mxu0 %v1095_v41 }
  0x7c   : > { %1098 = vmatprep.subr.bf16.mxu0 %v1097_v42 }
  0x7f   : > { %1100 = vmatpush1.bf16.msra.mxu0 %v1099_v45 }
  0x82   : > { %1064 = vmatmul.mubr.msk.f32.vlgmr.msra.gmra.mrb[0].mxu0 %vm360_vm1, %v338_v46 }
  0xf0   : > { %v358_v47 = vpop.permute.xlu0 %357 }
 0x155   : > { %v430_v48 = vpop.f32.mrb[0].mxu0 }
 0x156   : > { %v1810_v49 = vadd.f32 %v430_v48, %v358_v47  ;;  %v432_v50 = vpop.f32.mrb[1].mxu0 }
 0x157   : > { %v433_v51 = vadd.f32 %v432_v50, %v358_v47 }
 0x158   : > { %445 = vrot.lane.b32.xlu1 %v1810_v49, %s1517_s21  ;;  %436 = vrot.lane.b32.xlu0 %v1810_v49, %s1518_s22  ;;  %v481_v45 = vmul.f32 %v1810_v49, %v1768_v9 }
 0x159   : > { %v482_v44 = vmul.f32 %v433_v51, %v1770_v10 }
 0x15c   : > { %452 = vrot.lane.b32.xlu1 %v1810_v49, %s1519_s16  ;;  %447 = vrot.lane.b32.xlu0 %v433_v51, %s1517_s21 }
 0x160   : > { %438 = vrot.lane.b32.xlu1 %v433_v51, %s1518_s22  ;;  %454 = vrot.lane.b32.xlu0 %v433_v51, %s1519_s16 }
 0x164   : > { %459 = vrot.lane.b32.xlu1 %v1810_v49, %s1520_s17  ;;  %461 = vrot.lane.b32.xlu0 %v433_v51, %s1520_s17 }
 0x168   : > { %466 = vrot.lane.b32.xlu1 %v1810_v49, %s1521_s9  ;;  %468 = vrot.lane.b32.xlu0 %v433_v51, %s1521_s9 }
 0x16c   : > { %492 = vperm.xlu1 %1288, %v1750_v0  }
 0x1ca   : > { %v446_v54 = vpop.permute.xlu1 %445  ;;  %v437_v55 = vpop.permute.xlu0 %436 }
 0x1ce   : > { %v453_v57 = vpop.permute.xlu1 %452  ;;  %v448_v58 = vpop.permute.xlu0 %447 }
 0x1cf   : > { %v451_v59 = vsel %vm449_vm2, %v448_v58, %v446_v54  ;;  %v450_v60 = vsel %vm449_vm2, %v446_v54, %v448_v58  ;;  %v435_v58 = vld [vmem:[%s2051_s3] sm:$0xff] }
 0x1d0   : > { %v475_v20 = vmul.f32 %v451_v59, %v1756_v3  ;;  %v476_v25 = vmul.f32 %v450_v60, %v1758_v4  ;;  %v488_v50 = vmul.f32 %v451_v59, %v1782_v16 }
 0x1d2   : > { %v439_v61 = vpop.permute.xlu1 %438  ;;  %v455_v62 = vpop.permute.xlu0 %454 }
 0x1d3   : > { %v443_v63 = vsel %vm442_vm3, %v437_v55, %v439_v61  ;;  %v444_v19 = vsel %vm442_vm3, %v439_v61, %v437_v55  ;;  %v457_v22 = vsel %vm456_vm4, %v453_v57, %v455_v62  ;;  %v458_v23 = vsel %vm456_vm4, %v455_v62, %v453_v57 }
 0x1d4   : > { %v473_v21 = vmul.f32 %v444_v19, %v1752_v1  ;;  %v474_v24 = vmul.f32 %v443_v63, %v1754_v2  ;;  %v477_v32 = vmul.f32 %v458_v23, %v1760_v5  ;;  %v478_v33 = vmul.f32 %v457_v22, %v1762_v6 }
 0x1d5   : > { %v486_v46 = vmul.f32 %v444_v19, %v1778_v14  ;;  %v485_v52 = vmul.f32 %v443_v63, %v1776_v13  ;;  %v487_v55 = vmul.f32 %v450_v60, %v1780_v15  ;;  %v490_v57 = vmul.f32 %v458_v23, %v1786_v18  ;;  %v575_v23 = vld [vmem:[#allocation3] sm:$0xff] }
 0x1d6   : > { %v460_v26 = vpop.permute.xlu1 %459  ;;  %v462_v27 = vpop.permute.xlu0 %461  ;;  %v1103_v28 = vpack.c.bf16 %v475_v20, %v473_v21  ;;  %v1101_v31 = vpack.c.bf16 %v476_v25, %v474_v24  ;;  %v489_v49 = vmul.f32 %v457_v22, %v1784_v17  ;;  %v582_v25 = vld [vmem:[#allocation4] sm:$0xff] }
 0x1d7   : > { %v464_v29 = vsel %vm463_vm5, %v460_v26, %v462_v27  ;;  %v465_v30 = vsel %vm463_vm5, %v462_v27, %v460_v26  ;;  %v1113_v54 = vpack.c.bf16 %v488_v50, %v486_v46  ;;  %v1115_v51 = vpack.c.bf16 %v487_v55, %v485_v52 }
 0x1d8   : > { %v479_v34 = vmul.f32 %v465_v30, %v1764_v7  ;;  %v480_v35 = vmul.f32 %v464_v29, %v1766_v8  ;;  %1102 = vmatprep.subr.bf16.mxu1 %v1101_v31 }
 0x1d9   : > { %1104 = vmatpush1.bf16.msra.mxu1 %v1103_v28 }
 0x1da   : > { %v467_v36 = vpop.permute.xlu1 %466  ;;  %v469_v37 = vpop.permute.xlu0 %468  ;;  %v1105_v38 = vpack.c.bf16 %v480_v35, %v478_v33  ;;  %v1107_v39 = vpack.c.bf16 %v479_v34, %v477_v32 }
 0x1db   : > { %v471_v40 = vsel %vm470_vm6, %v467_v36, %v469_v37  ;;  %v472_v41 = vsel %vm470_vm6, %v469_v37, %v467_v36 }
 0x1dc   : > { %v483_v42 = vmul.f32 %v471_v40, %v1772_v11  ;;  %v484_v43 = vmul.f32 %v472_v41, %v1774_v12  ;;  %1106 = vmatprep.subr.bf16.mxu1 %v1105_v38 }
 0x1dd   : > { %1108 = vmatpush1.bf16.msra.mxu1 %v1107_v39  ;;  %v1878_v39 = vld [vmem:[%s2052_s4] sm:$0xff] (!%p1068_p10) }
 0x1de   : > { %v1109_v47 = vpack.c.bf16 %v484_v43, %v482_v44  ;;  %v1111_v48 = vpack.c.bf16 %v483_v42, %v481_v45  ;;  %v1884_v44 = vmov (!%p1068_p10), 0.0   ;;  %v1886_v45 = vmov (!%p1068_p10), 0.0  }
 0x1e0   : > { %1110 = vmatprep.subr.bf16.mxu1 %v1109_v47 }
 0x1e1   : > { %1112 = vmatpush1.bf16.msra.mxu1 %v1111_v48 }
 0x1e2   : > { %1114 = vmatprep.subr.bf16.mxu1 %v1113_v54 }
 0x1e5   : > { %1116 = vmatpush1.bf16.msra.mxu1 %v1115_v51 }
 0x1e6   : > { %515 = vmatprep.subr.mxu1 %v490_v57 }
 0x1e9   : > { %516 = vmatpush1.msra.mxu1 %v489_v49 }
 0x1ea   : > { %1065 = vmatmul.mubr.msk.f32.vlgmr.msra.gmra.mrb[0].mxu1 %vm495_vm7, %v435_v58 }
 0x1eb   : > { %v493_v59 = vpop.permute.xlu1 %492 }
 0x2bd   : > { %v565_v60 = vpop.f32.mrb[0].mxu1 }
 0x2be   : > { %v566_v61 = vadd.f32 %v565_v60, %v493_v59  ;;  %v567_v62 = vpop.f32.mrb[1].mxu1 }
 0x2bf   : > { %v568_v63 = vadd.f32 %v567_v62, %v493_v59 }
 0x2c0   : > { %573 = vst [vmem:[%s572_s24] sm:$0xff] %v566_v61  ;;  %v583_v19 = vmul.f32 %v566_v61, %v566_v61 }
 0x2c1   : > { %574 = vst [vmem:[%s572_s24 + $0x8] sm:$0xff] %v568_v63  ;;  %v576_v20 = vadd.f32 %v568_v63, %v566_v61  ;;  %v584_v21 = vmul.f32 %v568_v63, %v568_v63 }
 0x2c3   : > { %577 = vadd.xlane.f32.xlu0 %v576_v20  ;;  %v585_v22 = vadd.f32 %v584_v21, %v583_v19 }
 0x2c5   : > { %586 = vadd.xlane.f32.xlu1 %v585_v22 }
 0x34f   : > { %593 = sbr.rel (%p1068_p10) target bundleno = 2692 (0xa84), region = 68 }
 0x350   : > { %v578_v24 = vpop.xlane.xlu0 %577 }
 0x351   : > { %v579_v26 = vadd.f32 %v578_v24, %v575_v23 }
 0x352   : > { %v587_v27 = vpop.xlane.xlu1 %586 }
 0x353   : > { %581 = vst.msk [vmem:[#allocation3] sm:$0xff] %vm580_vm8, %v579_v26  ;;  %v588_v28 = vadd.f32 %v587_v27, %v582_v25 }
 0x355   : > { %589 = vst.msk [vmem:[#allocation4] sm:$0xff] %vm580_vm8, %v588_v28 }
 0x35a   : > { %v594_v29 = vld [vmem:[#allocation3] sm:$0xff] }
 0x35b   : > { %v597_v31 = vmul.f32 0.001953125, %v594_v29 }
 0x35c   : > { %v595_v30 = vld [vmem:[#allocation4] sm:$0xff] }
 0x35d   : > { %v598_v32 = vmul.f32 0.001953125, %v595_v30  ;;  %v599_v33 = vmul.f32 %v597_v31, %v597_v31 }
 0x35f   : > { %v600_v34 = vsub.f32 %v598_v32, %v599_v33 }
 0x361   : > { %v601_v35 = vadd.f32 1e-05, %v600_v34 }
 0x363   : > { %1290 = vrsqrt.f32 %v601_v35 }
 0x36d   : > { %v1291_v36 = vpop.eup %1290 }
 0x36e   : > { %604 = vrot.lane.b32.xlu0 %v1291_v36, %s1523_s14 }
 0x3e0   : > { %v605_v37 = vpop.permute.xlu0 %604 }
 0x3e1   : > { %v1872_v38 = vmul.f32 %v605_v37, %v1750_v0 }
 0x3e3   : > { %609 = vrot.lane.b32.xlu0 %v1872_v38, %s1524_s15 }
 0x455   : > { %v610_v40 = vpop.permute.xlu0 %609 }
 0x456   : > { %v612_v41 = vmul.f32 %v610_v40, %v597_v31 }
 0x458   : > { %614 = vrot.lane.b32.xlu1 %v612_v41, %s1525_s19 }
 0x4ca   : > { %v1880_v42 = vpop.permute.xlu1 %614 }
 0x4cb   : > { %v617_v43 = vsub.f32 %v1750_v0, %v1880_v42 }
 0x4cc LB: >> { %v1526_v46 = vmov 2   ;;  %v1527_v47 = vmov 3   ;;  %s1082_s10 = sshll.u32 %s1495_s23, 4  ;;  %s1528_s30 = smov 64   ;;  %v1533_v60 = vmov 0.0   ;;  %v1534_v61 = vmov 4   ;;  %s1495_s23 = sphi %s1888_s23, %s624_s23   ;;  %v1491_v45 = vphi %v1886_v45, %v2069_v45   ;;  %v1487_v44 = vphi %v1884_v44, %v2068_v44  }
 0x4cd   : >> { %1292 = vset.pattern.permute.xlu0 %v1526_v46  ;;  %s1904_s29 = scalar_lea.vmem [#allocation2], %s1082_s10  ;;  %s1529_s21 = smov 68   ;;  %766 = vmatprep.mubr.f32.mxu0 %v1533_v60 }
 0x4ce   : >> { %633 = vperm.xlu0 %1292, %v1872_v38   ;;  %v630_v50 = vld [vmem:[%s1904_s29] sm:$0xff]  ;;  %v631_v52 = vld [vmem:[%s1904_s29 + $0x8] sm:$0xff]  ;;  %s1530_s22 = smov 60   ;;  %s1531_s16 = smov 4   ;;  %1294 = vset.pattern.permute.xlu1 %v1534_v61 }
 0x4cf   : >> { %s1532_s17 = smov 124   ;;  %s624_s23 = sadd.s32 1, %s1495_s23  }
 0x4d0   : >> { %p621_p1 = scmp.ge.s32.totalorder %s624_s23, 2  }
 0x4d1   : > { %s1535_s11 = smov (%p621_p1), 1   ;;  %s1978_s13 = smov (%p621_p1), 0  }
 0x4d2   : >> { %1293 = vset.pattern.permute.xlu0 %v1527_v47 }
 0x4d3   : >> { %640 = vperm.xlu0 %1293, %v617_v43  }
 0x4d7   : >> { %1295 = vset.pattern.permute.xlu0 %v1534_v61 }
 0x54d   : >> { %v634_v48 = vpop.permute.xlu0 %633 }
 0x54e   : >> { %v636_v54 = vmul.f32 %v634_v48, %v630_v50  ;;  %v637_v55 = vmul.f32 %v634_v48, %v631_v52 }
 0x552   : >> { %v641_v51 = vpop.permute.xlu0 %640 }
 0x553   : >> { %v643_v57 = vadd.f32 %v641_v51, %v636_v54  ;;  %v644_v49 = vadd.f32 %v641_v51, %v637_v55 }
 0x555   : >> { %v645_v58 = vmax.f32 %v643_v57, 0.0  ;;  %v646_v59 = vmax.f32 %v644_v49, 0.0 }
 0x557   : >> { %655 = vrot.lane.b32.xlu0 %v646_v59, %s1528_s30  ;;  %647 = vrot.lane.b32.xlu1 %v645_v58, %s1529_s21  ;;  %v686_v49 = vmul.f32 %v646_v59, %v1770_v10 }
 0x55b   : >> { %661 = vrot.lane.b32.xlu0 %v646_v59, %s1530_s22  ;;  %649 = vrot.lane.b32.xlu1 %v646_v59, %s1529_s21 }
 0x55f   : >> { %667 = vrot.lane.b32.xlu0 %v646_v59, %s1531_s16  ;;  %653 = vrot.lane.b32.xlu1 %v645_v58, %s1528_s30 }
 0x563   : >> { %673 = vrot.lane.b32.xlu0 %v646_v59, %s1532_s17  ;;  %659 = vrot.lane.b32.xlu1 %v645_v58, %s1530_s22 }
 0x567   : >> { %665 = vrot.lane.b32.xlu1 %v645_v58, %s1531_s16 }
 0x56b   : >> { %671 = vrot.lane.b32.xlu1 %v645_v58, %s1532_s17 }
 0x56f   : >> { %696 = vperm.xlu1 %1294, %v1750_v0  }
 0x5c9   : >> { %v648_v62 = vpop.permute.xlu1 %647  ;;  %v656_v63 = vpop.permute.xlu0 %655 }
 0x5cd   : >> { %v650_v19 = vpop.permute.xlu1 %649  ;;  %v662_v22 = vpop.permute.xlu0 %661 }
 0x5ce   : >> { %v651_v20 = vsel %vm442_vm3, %v648_v62, %v650_v19  ;;  %v652_v21 = vsel %vm442_vm3, %v650_v19, %v648_v62 }
 0x5cf   : >> { %v677_v26 = vmul.f32 %v652_v21, %v1752_v1  ;;  %v678_v28 = vmul.f32 %v651_v20, %v1754_v2  ;;  %v690_v19 = vmul.f32 %v652_v21, %v1778_v14  ;;  %v689_v59 = vmul.f32 %v651_v20, %v1776_v13 }
 0x5d1   : >> { %v654_v23 = vpop.permute.xlu1 %653  ;;  %v668_v33 = vpop.permute.xlu0 %667 }
 0x5d2   : >> { %v657_v24 = vsel %vm449_vm2, %v654_v23, %v656_v63  ;;  %v658_v25 = vsel %vm449_vm2, %v656_v63, %v654_v23  ;;  %v685_v63 = vmul.f32 %v645_v58, %v1768_v9 }
 0x5d3   : >> { %v679_v27 = vmul.f32 %v658_v25, %v1756_v3  ;;  %v680_v29 = vmul.f32 %v657_v24, %v1758_v4  ;;  %v692_v60 = vmul.f32 %v658_v25, %v1782_v16  ;;  %v1974_v3 = vmov (%p621_p1), 0.0  }
 0x5d4   : > { %v1976_v4 = vmov (%p621_p1), 0.0  }
 0x5d5   : >> { %v660_v30 = vpop.permute.xlu1 %659  ;;  %v1117_v31 = vpack.c.bf16 %v680_v29, %v678_v28  ;;  %v1119_v32 = vpack.c.bf16 %v679_v27, %v677_v26  ;;  %v674_v50 = vpop.permute.xlu0 %673  ;;  %v691_v26 = vmul.f32 %v657_v24, %v1780_v15  ;;  %v1129_v27 = vpack.c.bf16 %v692_v60, %v690_v19 }
 0x5d6   : >> { %v663_v34 = vsel %vm456_vm4, %v660_v30, %v662_v22  ;;  %v664_v35 = vsel %vm456_vm4, %v662_v22, %v660_v30 }
 0x5d7   : >> { %1118 = vmatprep.subr.bf16.mxu0 %v1117_v31  ;;  %v681_v41 = vmul.f32 %v664_v35, %v1760_v5  ;;  %v682_v46 = vmul.f32 %v663_v34, %v1762_v6  ;;  %v1131_v25 = vpack.c.bf16 %v691_v26, %v689_v59  ;;  %v694_v28 = vmul.f32 %v664_v35, %v1786_v18 }
 0x5d8   : >> { %1120 = vmatpush1.bf16.msra.mxu0 %v1119_v32  ;;  %v693_v58 = vmul.f32 %v663_v34, %v1784_v17 }
 0x5d9   : >> { %v666_v36 = vpop.permute.xlu1 %665 }
 0x5da   : >> { %v669_v37 = vsel %vm463_vm5, %v666_v36, %v668_v33  ;;  %v670_v40 = vsel %vm463_vm5, %v668_v33, %v666_v36 }
 0x5db   : >> { %v683_v47 = vmul.f32 %v670_v40, %v1764_v7  ;;  %v684_v48 = vmul.f32 %v669_v37, %v1766_v8 }
 0x5dd   : >> { %v672_v52 = vpop.permute.xlu1 %671  ;;  %v1121_v54 = vpack.c.bf16 %v684_v48, %v682_v46  ;;  %v1123_v55 = vpack.c.bf16 %v683_v47, %v681_v41 }
 0x5de   : >> { %v675_v51 = vsel %vm470_vm6, %v672_v52, %v674_v50  ;;  %v676_v57 = vsel %vm470_vm6, %v674_v50, %v672_v52 }
 0x5df   : >> { %v687_v61 = vmul.f32 %v675_v51, %v1772_v11  ;;  %v688_v62 = vmul.f32 %v676_v57, %v1774_v12  ;;  %1122 = vmatprep.subr.bf16.mxu0 %v1121_v54 }
 0x5e0   : >> { %1124 = vmatpush1.bf16.msra.mxu0 %v1123_v55 }
 0x5e1   : >> { %v1125_v22 = vpack.c.bf16 %v688_v62, %v686_v49  ;;  %v1127_v23 = vpack.c.bf16 %v687_v61, %v685_v63 }
 0x5e3   : >> { %1126 = vmatprep.subr.bf16.mxu0 %v1125_v22 }
 0x5e4   : >> { %1128 = vmatpush1.bf16.msra.mxu0 %v1127_v23 }
 0x5e5   : >> { %1130 = vmatprep.subr.bf16.mxu0 %v1129_v27 }
 0x5e8   : >> { %1132 = vmatpush1.bf16.msra.mxu0 %v1131_v25 }
 0x5e9   : >> { %718 = vmatprep.subr.mxu0 %v694_v28 }
 0x5ec   : >> { %719 = vmatpush1.msra.mxu0 %v693_v58 }
 0x5ed   : >> { %1071 = vmatmul.mubr.msk.f32.vlgmr.msra.gmra.mrb[0].mxu0 %vm495_vm7, %v1878_v39 }
 0x5ee   : >> { %v697_v21 = vpop.permute.xlu1 %696 }
 0x6c0   : >> { %v768_v24 = vpop.f32.mrb[0].mxu0 }
 0x6c1   : >> { %v769_v29 = vadd.f32 %v768_v24, %v697_v21  ;;  %v770_v30 = vpop.f32.mrb[1].mxu0 }
 0x6c2   : >> { %v771_v31 = vadd.f32 %v770_v30, %v697_v21 }
 0x6c3   : >> { %773 = vst [vmem:[%s1904_s29] sm:$0xff] %v769_v29  ;;  %v779_v20 = vmul.f32 %v769_v29, %v769_v29 }
 0x6c4   : >> { %774 = vst [vmem:[%s1904_s29 + $0x8] sm:$0xff] %v771_v31  ;;  %v775_v32 = vadd.f32 %v771_v31, %v769_v29  ;;  %v780_v33 = vmul.f32 %v771_v31, %v771_v31 }
 0x6c6   : >> { %776 = vadd.xlane.f32.xlu0 %v775_v32  ;;  %v781_v35 = vadd.f32 %v780_v33, %v779_v20 }
 0x6c8   : >> { %782 = vadd.xlane.f32.xlu1 %v781_v35 }
 0x752   : > { %623 = sbr.rel (!%p621_p1) target bundleno = 1228 (0x4cc), region = 119 }
 0x753   : >> { %v777_v36 = vpop.xlane.xlu0 %776 }
 0x754   : >> { %v778_v34 = vadd.f32 %v1491_v45, %v777_v36  }
 0x755   : >> { %v783_v37 = vpop.xlane.xlu1 %782 }
 0x756   : >> { %v784_v40 = vadd.f32 %v1487_v44, %v783_v37   ;;  %v2069_v45 = vmov %v778_v34  ;;  %v785_v41 = vmul.f32 (%p621_p1), 0.001953125, %v778_v34 }
 0x757   : > { %v1963_v45 = vld [vmem:[%s2053_s5] sm:$0xff] (%p621_p1) }
 0x758   : >> { %v2068_v44 = vmov %v784_v40  ;;  %v786_v46 = vmul.f32 (%p621_p1), 0.001953125, %v784_v40  ;;  %v787_v47 = vmul.f32 (%p621_p1), %v785_v41, %v785_v41 }
 0x75a   : > { %v788_v48 = vsub.f32 %v786_v46, %v787_v47 }
 0x75c   : > { %v789_v50 = vadd.f32 1e-05, %v788_v48 }
 0x75e   : > { %1296 = vrsqrt.f32 %v789_v50 }
 0x768   : > { %v1297_v52 = vpop.eup %1296 }
 0x769   : > { %v1966_v54 = vmul.f32 %v1297_v52, %v1750_v0 }
 0x76b   : > { %v792_v55 = vmul.f32 %v1966_v54, %v785_v41 }
 0x76d   : > { %794 = vrot.lane.b32.xlu0 %v792_v55, %s1535_s11 }
 0x7df   : > { %v1970_v1 = vpop.permute.xlu0 %794 }
 0x7e0   : > { %v797_v2 = vsub.f32 %v1750_v0, %v1970_v1 }
 0x7e1 LB: >> { %v1536_v5 = vmov 5   ;;  %v1537_v6 = vmov 0   ;;  %v1538_v7 = vmov 6   ;;  %v1539_v8 = vmov 7   ;;  %s1083_s24 = sshll.u32 %s1507_s13, 4  ;;  %s875_s15 = sshra.s32 %s1507_s13, 1  ;;  %s1507_s13 = sphi %s1978_s13, %s804_s13   ;;  %v1503_v4 = vphi %v1976_v4, %v2071_v4   ;;  %v1499_v3 = vphi %v1974_v3, %v2070_v3  }
 0x7e2   : >> { %1298 = vset.pattern.permute.xlu0 %v1536_v5  ;;  %1300 = vset.pattern.permute.xlu1 %v1537_v6  ;;  %s809_s14 = scalar_lea.vmem [#allocation2], %s1083_s24  ;;  %v1540_v60 = vmov 1966171168   ;;  %v860_v22 = vshrl.u32 %v440_v53, 7  ;;  %s878_s12 = sand.u32 1, %s1507_s13  ;;  %vm884_vm9 = vcmask 1040384  }
 0x7e3   : >> { %814 = vperm.xlu0 %1298, %v1966_v54   ;;  %830 = vperm.xlu1 %1300, %v1963_v45   ;;  %v810_v10 = vld [vmem:[%s809_s14] sm:$0xff]  ;;  %v811_v11 = vld [vmem:[%s809_s14 + $0x8] sm:$0xff]  ;;  %v857_v61 = vunpack.c.l.s4 %v1540_v60  ;;  %s1084_s18 = sshll.u32 %s875_s15, 2  ;;  %vm873_vm10 = vcmp.lt.s32.totalorder %v440_v53, 256  ;;  %s804_s13 = sadd.s32 1, %s1507_s13  }
 0x7e4   : >> { %s881_s19 = sadd.s32 %s1084_s18, %s878_s12  ;;  %p801_p4 = scmp.ge.s32.totalorder %s804_s13, 2  }
 0x7e5   : >> { %v858_v19 = vunpack.c.0.s8 %v857_v61  ;;  %s882_s23 = scalar_lea.vmem [#allocation11], %s881_s19  ;;  %s1541_s30 = smov (%p801_p4), 120  }
 0x7e6   : > { %s1542_s21 = smov (%p801_p4), 119  }
 0x7e7   : >> { %1299 = vset.pattern.permute.xlu0 %v1538_v7  ;;  %1301 = vset.pattern.permute.xlu1 %v1539_v8  ;;  %v861_v28 = vsub.s32 %v858_v19, %v860_v22 }
 0x7e8   : >> { %821 = vperm.xlu0 %1299, %v797_v2   ;;  %848 = vperm.xlu1 %1301, %v1750_v0  }
 0x7ec   : >> { %1302 = vset.pattern.permute.xlu0 %v1539_v8 }
 0x862   : >> { %v815_v9 = vpop.permute.xlu0 %814  ;;  %v831_v17 = vpop.permute.xlu1 %830 }
 0x863   : >> { %v817_v12 = vmul.f32 %v815_v9, %v810_v10  ;;  %v818_v13 = vmul.f32 %v815_v9, %v811_v11 }
 0x867   : >> { %v822_v14 = vpop.permute.xlu0 %821  ;;  %v849_v27 = vpop.permute.xlu1 %848 }
 0x868   : >> { %v824_v15 = vadd.f32 %v822_v14, %v817_v12  ;;  %v825_v16 = vadd.f32 %v822_v14, %v818_v13 }
 0x86a   : >> { %v826_v18 = vmax.f32 %v824_v15, 0.0  ;;  %v827_v56 = vmax.f32 %v825_v16, 0.0 }
 0x86c   : >> { %v833_v38 = vmul.f32 %v831_v17, %v826_v18  ;;  %v834_v39 = vmul.f32 %v831_v17, %v827_v56 }
 0x86e   : >> { %v835_v42 = vrot.slane %v833_v38, 4  ;;  %v841_v43 = vrot.slane %v834_v39, 4 }
 0x870   : >> { %v836_v44 = vadd.f32 %v835_v42, %v833_v38  ;;  %v842_v51 = vadd.f32 %v841_v43, %v834_v39 }
 0x872   : >> { %v837_v57 = vrot.slane %v836_v44, 2  ;;  %v843_v49 = vrot.slane %v842_v51, 2 }
 0x874   : >> { %v838_v62 = vadd.f32 %v837_v57, %v836_v44  ;;  %v844_v63 = vadd.f32 %v843_v49, %v842_v51 }
 0x876   : >> { %v839_v23 = vrot.slane %v838_v62, 1  ;;  %v845_v26 = vrot.slane %v844_v63, 1 }
 0x878   : >> { %v840_v59 = vadd.f32 %v839_v23, %v838_v62  ;;  %v846_v25 = vadd.f32 %v845_v26, %v844_v63 }
 0x87a   : >> { %v851_v58 = vadd.f32 %v849_v27, %v840_v59  ;;  %v852_v21 = vadd.f32 %v849_v27, %v846_v25 }
 0x87c   : >> { %v855_v24 = vcombine.low %v851_v58, %v852_v21  ;;  %v885_v29 = vsel %vm884_vm9, %v851_v58, 0.0  ;;  %v886_v30 = vsel %vm884_vm9, %v852_v21, 0.0  ;;  %v899_v31 = vmul.f32 %v851_v58, %v851_v58 }
 0x87d   : >> { %v887_v20 = vadd.f32 %v886_v30, %v885_v29  ;;  %v900_v32 = vmul.f32 %v852_v21, %v852_v21 }
 0x87e   : >> { %v862_v33 = vrot.slane %v855_v24, %v861_v28  ;;  %v901_v35 = vsel %vm884_vm9, %v899_v31, 0.0 }
 0x87f   : >> { %888 = vadd.xlane.f32.xlu1 %v887_v20  ;;  %v902_v36 = vsel %vm884_vm9, %v900_v32, 0.0 }
 0x880   : >> { %v869_v34 = vrot.slane %v862_v33, %v861_v28  ;;  %v903_v37 = vadd.f32 %v902_v36, %v901_v35 }
 0x882   : >> { %883 = vst.msk [vmem:[%s882_s23] ss:$2 sm:$0x3] %vm873_vm10, %v869_v34  ;;  %904 = vadd.xlane.f32.xlu0 %v903_v37 }
 0x889   : > { %v928_v45 = vld [vmem:[#allocation11] sm:$0xf] (%p801_p4) }
 0x90c   : >> { %v889_v40 = vpop.xlane.xlu1 %888 }
 0x90d   : >> { %v890_v41 = vrot.slane %v889_v40, 4 }
 0x90f   : >> { %v891_v46 = vadd.f32 %v890_v41, %v889_v40  ;;  %v905_v47 = vpop.xlane.xlu0 %904 }
 0x910   : >> { %v906_v48 = vrot.slane %v905_v47, 4 }
 0x911   : >> { %v892_v50 = vrot.slane %v891_v46, 2 }
 0x912   : >> { %v907_v52 = vadd.f32 %v906_v48, %v905_v47 }
 0x913   : >> { %v893_v55 = vadd.f32 %v892_v50, %v891_v46 }
 0x914   : >> { %v908_v5 = vrot.slane %v907_v52, 2 }
 0x915   : >> { %v894_v6 = vrot.slane %v893_v55, 1 }
 0x916   : >> { %v909_v7 = vadd.f32 %v908_v5, %v907_v52 }
 0x917   : >> { %v895_v8 = vadd.f32 %v894_v6, %v893_v55 }
 0x918   : >> { %v910_v9 = vrot.slane %v909_v7, 1 }
 0x919   : >> { %1133 = vpush %v895_v8 }
 0x91a   : >> { %v911_v10 = vadd.f32 %v910_v9, %v909_v7 }
 0x91c   : >> { %1135 = vpush %v911_v10 }
 0x94a   : >> { %s1134_s10 = spop %1133 }
 0x94b   : >> { %v897_v11 = vstv %s1134_s10  ;;  %803 = sbr.rel (!%p801_p4) target bundleno = 2017 (0x7e1), region = 130 }
 0x94c   : >> { %v898_v12 = vadd.f32 %v1503_v4, %v897_v11  }
 0x94d   : >> { %s1136_s29 = spop %1135 }
 0x94e   : >> { %v913_v13 = vstv %s1136_s29  ;;  %v2071_v4 = vmov %v898_v12  ;;  %v915_v15 = vmul.f32 (%p801_p4), 0.001953125, %v898_v12 }
 0x94f   : >> { %v914_v14 = vadd.f32 %v1499_v3, %v913_v13  }
 0x950   : > { %v917_v17 = vmul.f32 (%p801_p4), %v915_v15, %v915_v15 }
 0x951   : >> { %v2070_v3 = vmov %v914_v14  ;;  %v916_v16 = vmul.f32 (%p801_p4), 0.001953125, %v914_v14 }
 0x953   : > { %v918_v18 = vsub.f32 %v916_v16, %v917_v17 }
 0x955   : > { %v919_v56 = vadd.f32 1e-05, %v918_v18 }
 0x957   : > { %1303 = vrsqrt.f32 %v919_v56 }
 0x961   : > { %v1304_v4 = vpop.eup %1303 }
 0x962   : > { %v921_v38 = vmul.f32 %v1304_v4, %v1750_v0 }
 0x964   : > { %v922_v39 = vmul.f32 %v921_v38, %v915_v15 }
 0x966   : > { %924 = vrot.lane.b32.xlu0 %v922_v39, %s1535_s11 }
 0x96a   : > { %930 = vrot.lane.b32.xlu0 %v921_v38, %s1541_s30 }
 0x9d8   : > { %v925_v42 = vpop.permute.xlu0 %924 }
 0x9d9   : > { %v927_v43 = vsub.f32 %v1750_v0, %v925_v42 }
 0x9db   : > { %937 = vrot.lane.b32.xlu1 %v927_v43, %s1542_s21 }
 0x9dc   : > { %v931_v44 = vpop.permute.xlu0 %930 }
 0x9dd   : > { %1137 = vpush %v931_v44 }
 0xa0e   : > { %s1138_s22 = spop %1137 }
 0xa0f   : > { %v933_v54 = vstv %s1138_s22 }
 0xa10   : > { %v935_v1 = vmul.f32 %v933_v54, %v928_v45 }
 0xa4d   : > { %v938_v53 = vpop.permute.xlu1 %937 }
 0xa4e   : > { %1139 = vpush %v938_v53 }
 0xa7f   : > { %s1140_s16 = spop %1139 }
 0xa80   : > { %v940_v2 = vstv %s1140_s16 }
 0xa81   : > { %v942_v3 = vadd.f32 %v940_v2, %v935_v1 }
 0xa83   : > { %943 = vst [vmem:[#allocation11] sm:$0xf] %v942_v3 }
 0xa84 PF: > { %p1171_p5 = scmp.eq.s32.totalorder %s1603_s28, 1  ;;  %s1543_s17 = smov [#allocation11]  }
 0xa85   : > { %s951_s9 = sshll.u32 %s1543_s17, 4  ;;  %s952_s9 = int_to_ptr.vmem [resolvable:$true] %s951_s9 }
 0xa86   : > { %s1391_s27 = scalar_lea.vmem %s952_s9, 64  ;;  %p1398_p0 = scmp.lt.s32.totalorder %s952_s9, %s952_s9 }
 0xa87   : > { %p1392_p6 = scmp.ne.s32.totalorder %s952_s9, %s1391_s27  ;;  %p1399_p2 = scmp.lt.s32.totalorder %s1391_s27, %s1391_s27 }
 0xa89   : > { %p1393_p9 = pnand %p1392_p6, %p1171_p5  ;;  %p1400_p11 = por %p1399_p2, %p1398_p0 }
 0xa8b   : > { %p1394_p12 = pneg %p1393_p9 }
 0xa8d   : > { %p1401_p13 = pnand %p1400_p11, %p1394_p12 }
 0xa8f   : > { %1404 = shalt.err (!%p1401_p13)
}
 0xa90   : > { %s1405_s24 = scalar_lea.hbm %s2055_s7, 64 }
 0xa91   : > { %p1406_p3 = scmp.ne.s32.totalorder %s2055_s7, %s1405_s24  ;;  %p1411_p10 = scmp.lt.u32.totalorder %s1405_s24, %s2055_s7 }
 0xa93   : > { %p1407_p8 = pnand %p1406_p3, %p1171_p5 }
 0xa95   : > { %p1408_p7 = pneg %p1407_p8 }
 0xa97   : > { %p1413_p1 = pnand %p1411_p10, %p1408_p7 }
 0xa99   : > { %1416 = shalt.err (!%p1413_p1)
}
 0xa9a   : > { %1152 = dma.vmem_to_hbm [thread:$0]  (%p1171_p5), %s952_s9, 64, %s2055_s7, [#allocation7]  }
 0xa9b   : > { %1466 = dma.done.wait (%p1171_p5), [#allocation7], 64  }
 0xa9c   : > { %1468 = vsyncadd (%p1171_p5), [#allocation7], 4294967232 }
 0xa9d PF: > { %p19_p4 = scmp.ge.s32.totalorder %s1681_s20, 4   ;;  %s2072_s24 = smov %s1475_s25 }
 0xa9e   : > { %s2073_s25 = smov %s1479_s26  ;;  %s2074_s26 = smov %s1692_s8 }
 0xa9f   : > { %s2075_s27 = smov %s1681_s20  ;;  %21 = sbr.rel (!%p19_p4) target bundleno = 5 (0x5), region = 141 }
 0xaa6   :  { %964 = vsyncpa [#allocation6], 1 }
 0xaa7   :  { %966 = vsyncpa [#allocation6 + $0x1], 1 }
 0xaa8   :  { %967 = vsyncpa [#allocation9], 1 }
 0xaa9   :  { %968 = vsyncpa [#allocation7], 1 }
 0xaaa   :  { %970 = vsyncpa [#allocation7 + $0x1], 1 }

</bundles_post_ra>
